<compile_context>
chip_gen: v7x
topology: tpu7x:2x2x1
jax: 0.10.0
libtpu: 0.0.40
codegen_flags: <defaults>
</compile_context>

<pallas_src>
import math

import jax
import jax.numpy as jnp
from jax import lax
from jax.experimental import pallas as pl
from jax.experimental.pallas import tpu as pltpu

# ---------------- config (mirrors the ChronosConfig fields used in forward) --
BATCH = 2
SEQ = 8                  # context_length
D_MODEL = 32
D_FF = 64
N_TOKENS = 64
V_PAD = 128              # lane-dense padded vocab width for the LM head
N_SPECIAL_TOKENS = 2
PAD_TOKEN_ID = 0         # also the seq2seq decoder-start token
EOS_TOKEN_ID = 1
PRED_LEN = 4             # prediction_length
NUM_SAMPLES = 2
TEMPERATURE = 1.0
TOP_K = 50
TOP_P = 1.0
NEG_INF = -1e9


def _rmsnorm(x):
    var = jnp.mean(x * x, axis=-1, keepdims=True)
    return x * lax.rsqrt(var + 1e-6)


# ------------------------------- encoder kernel ------------------------------
# Single block: whole (B, S, D) batch fused.  Also emits the cross-attention
# K/V (enc_h @ cwk, enc_h @ cwv) so the decode loop never recomputes them.
def encoder_kernel(x_ref, mask_ref, wq_ref, wk_ref, wv_ref, wo_ref,
                   w1_ref, w2_ref, cwk_ref, cwv_ref, k2_ref, v2_ref):
    B, S, D = x_ref.shape
    x = x_ref[...]                                    # (B, S, D)
    bias = (mask_ref[...] - 1.0) * 1e9                # (B, S): 0 keep, -1e9 mask
    scale = 1.0 / math.sqrt(D)

    # pre-norm self-attention (batch folded into the matmul M dimension)
    xn = _rmsnorm(x).reshape(B * S, D)
    q = jnp.dot(xn, wq_ref[...], preferred_element_type=jnp.float32).reshape(B, S, D)
    k = jnp.dot(xn, wk_ref[...], preferred_element_type=jnp.float32).reshape(B, S, D)
    v = jnp.dot(xn, wv_ref[...], preferred_element_type=jnp.float32).reshape(B, S, D)
    s = jnp.einsum('bqd,bkd->bqk', q, k,
                   preferred_element_type=jnp.float32) * scale + bias[:, None, :]
    p = jax.nn.softmax(s, axis=-1)
    attn = jnp.einsum('bqk,bkd->bqd', p, v, preferred_element_type=jnp.float32)
    h = x + jnp.dot(attn.reshape(B * S, D), wo_ref[...],
                    preferred_element_type=jnp.float32).reshape(B, S, D)

    # pre-norm FFN
    hn = _rmsnorm(h).reshape(B * S, D)
    ff = jnp.dot(
        jax.nn.relu(jnp.dot(hn, w1_ref[...], preferred_element_type=jnp.float32)),
        w2_ref[...], preferred_element_type=jnp.float32)
    eh = h.reshape(B * S, D) + ff                     # encoder hidden (B*S, D)

    # hoisted cross-attention K/V for the decoder
    k2_ref[...] = jnp.dot(eh, cwk_ref[...],
                          preferred_element_type=jnp.float32).reshape(B, S, D)
    v2_ref[...] = jnp.dot(eh, cwv_ref[...],
                          preferred_element_type=jnp.float32).reshape(B, S, D)


def run_encoder(x_emb, mask_f, params):
    B, S, D = x_emb.shape
    F = params["enc_w1"].shape[1]
    wspec = lambda shape: pl.BlockSpec(shape, lambda i: (0,) * len(shape))
    return pl.pallas_call(
        encoder_kernel,
        out_shape=(jax.ShapeDtypeStruct((B, S, D), jnp.float32),
                   jax.ShapeDtypeStruct((B, S, D), jnp.float32)),
        grid=(1,),
        in_specs=[
            pl.BlockSpec((B, S, D), lambda i: (0, 0, 0)),
            pl.BlockSpec((B, S), lambda i: (0, 0)),
            wspec((D, D)), wspec((D, D)), wspec((D, D)), wspec((D, D)),
            wspec((D, F)), wspec((F, D)), wspec((D, D)), wspec((D, D)),
        ],
        out_specs=(pl.BlockSpec((B, S, D), lambda i: (0, 0, 0)),
                   pl.BlockSpec((B, S, D), lambda i: (0, 0, 0))),
        compiler_params=pltpu.CompilerParams(dimension_semantics=("arbitrary",)),
    )(x_emb, mask_f,
      params["enc_wq"], params["enc_wk"], params["enc_wv"], params["enc_wo"],
      params["enc_w1"], params["enc_w2"], params["dec_cwk"], params["dec_cwv"])


# ---------------------------- decoder step kernel ----------------------------
# One decode step: self-attention K/V over the current prefix (cheap, depends
# only on embeddings for this single-layer decoder), then attention /
# cross-attention / FFN / LM-head for row t only.  Step index t arrives via
# scalar prefetch (SMEM).  Output is a lane-dense (blk, 1, V_PAD) logits slab.
def decoder_step_kernel(t_ref, dec_ref, k2_ref, v2_ref, bias_ref,
                        swq_ref, swk_ref, swv_ref, swo_ref,
                        cwq_ref, cwo_ref, w1_ref, w2_ref, wl_ref, o_ref):
    Bb, T, D = dec_ref.shape
    t = t_ref[0]
    scale = 1.0 / math.sqrt(D)

    # self-attention K/V for all prefix positions (rows > t are masked below)
    x = dec_ref[...]                                   # (Bb, T, D)
    xn = _rmsnorm(x).reshape(Bb * T, D)
    k = jnp.dot(xn, swk_ref[...], preferred_element_type=jnp.float32).reshape(Bb, T, D)
    v = jnp.dot(xn, swv_ref[...], preferred_element_type=jnp.float32).reshape(Bb, T, D)

    # row-t query and causal attention
    xt = dec_ref[:, pl.ds(t, 1), :].reshape(Bb, D)     # (Bb, D)
    xtn = _rmsnorm(xt)
    q = jnp.dot(xtn, swq_ref[...], preferred_element_type=jnp.float32)
    s = jnp.einsum('bqd,bkd->bqk', q[:, None, :], k,
                   preferred_element_type=jnp.float32) * scale      # (Bb, 1, T)
    pos = lax.broadcasted_iota(jnp.int32, (Bb, 1, T), 2)
    s = jnp.where(pos <= t, s, NEG_INF)
    p = jax.nn.softmax(s, axis=-1)
    attn = jnp.einsum('bqk,bkd->bqd', p, v,
                      preferred_element_type=jnp.float32).reshape(Bb, D)
    h = xt + jnp.dot(attn, swo_ref[...], preferred_element_type=jnp.float32)

    # cross-attention against the precomputed encoder K/V
    hn = _rmsnorm(h)
    q2 = jnp.dot(hn, cwq_ref[...], preferred_element_type=jnp.float32)
    s2 = jnp.einsum('bqd,bkd->bqk', q2[:, None, :], k2_ref[...],
                    preferred_element_type=jnp.float32) * scale     # (Bb, 1, S)
    s2 = s2 + bias_ref[...]
    p2 = jax.nn.softmax(s2, axis=-1)
    cross = jnp.einsum('bqk,bkd->bqd', p2, v2_ref[...],
                       preferred_element_type=jnp.float32).reshape(Bb, D)
    h = h + jnp.dot(cross, cwo_ref[...], preferred_element_type=jnp.float32)

    # FFN (pre-norm)
    hn = _rmsnorm(h)
    h = h + jnp.dot(
        jax.nn.relu(jnp.dot(hn, w1_ref[...], preferred_element_type=jnp.float32)),
        w2_ref[...], preferred_element_type=jnp.float32)

    # LM head (row t only, padded-128 vocab -> unmasked lane-dense store)
    logits = jnp.dot(_rmsnorm(h), wl_ref[...], preferred_element_type=jnp.float32)
    o_ref[...] = logits.reshape(Bb, 1, -1).astype(o_ref.dtype)


def run_decoder_step(t, dec_emb, k2, v2, enc_bias, params):
    Bs, T, D = dec_emb.shape
    S = k2.shape[1]
    F = params["dec_w1"].shape[1]
    Vp = params["lm_head_p"].shape[1]
    nblk = 2 if Bs % 2 == 0 else 1       # 2-way parallel grid -> both v7x TCs
    bb = Bs // nblk

    wspec = lambda shape: pl.BlockSpec(shape, lambda i, t_ref: (0,) * len(shape))
    t_arr = jnp.asarray(t, dtype=jnp.int32).reshape((1,))

    grid_spec = pltpu.PrefetchScalarGridSpec(
        num_scalar_prefetch=1,
        grid=(nblk,),
        in_specs=[
            pl.BlockSpec((bb, T, D), lambda i, t_ref: (i, 0, 0)),
            pl.BlockSpec((bb, S, D), lambda i, t_ref: (i, 0, 0)),
            pl.BlockSpec((bb, S, D), lambda i, t_ref: (i, 0, 0)),
            pl.BlockSpec((bb, 1, S), lambda i, t_ref: (i, 0, 0)),
            wspec((D, D)), wspec((D, D)), wspec((D, D)), wspec((D, D)),
            wspec((D, D)), wspec((D, D)),
            wspec((D, F)), wspec((F, D)), wspec((D, Vp)),
        ],
        out_specs=pl.BlockSpec((bb, 1, Vp), lambda i, t_ref: (i, 0, 0)),
    )
    out = pl.pallas_call(
        decoder_step_kernel,
        out_shape=jax.ShapeDtypeStruct((Bs, 1, Vp), jnp.float32),
        grid_spec=grid_spec,
        compiler_params=pltpu.CompilerParams(dimension_semantics=("parallel",)),
    )(t_arr, dec_emb, k2, v2, enc_bias,
      params["dec_swq"], params["dec_swk"], params["dec_swv"], params["dec_swo"],
      params["dec_cwq"], params["dec_cwo"],
      params["dec_w1"], params["dec_w2"], params["lm_head_p"])
    return out[:, 0, :]                                # (Bs, Vp)


# ------------------------------ sampling helpers -----------------------------
def _filter_top_k_top_p(logits, top_k, top_p):
    # TODO(synk): sort-based top-k / top-p filtering stays in JAX (no clean
    # Pallas sorting primitive); the logits feeding it are computed in-kernel.
    V = logits.shape[-1]
    if top_k is not None and 0 < top_k < V:
        kth = jnp.sort(logits, axis=-1)[:, V - top_k][:, None]
        logits = jnp.where(logits < kth, NEG_INF, logits)
    if top_p is not None and top_p < 1.0:
        sl = jnp.sort(logits, axis=-1)[:, ::-1]
        probs = jax.nn.softmax(sl, axis=-1)
        cum = jnp.cumsum(probs, axis=-1)
        remove = (cum - probs) > top_p
        thresh = jnp.min(jnp.where(remove, jnp.inf, sl), axis=-1, keepdims=True)
        logits = jnp.where(logits < thresh, NEG_INF, logits)
    return logits


# ----------------------- ChronosModel.forward equivalent ---------------------
def chronos_forward(params, input_ids, attention_mask, key,
                    prediction_length=PRED_LEN, num_samples=NUM_SAMPLES,
                    temperature=TEMPERATURE, top_k=TOP_K, top_p=TOP_P):
    batch, seq = input_ids.shape
    emb = params["embedding"]                                     # (V, D)
    mask_f = attention_mask.astype(jnp.float32)                   # (B, S)

    # encoder runs once per original batch row; samples share its output
    x_emb = emb[input_ids]                                        # (B, S, D)
    k2_b, v2_b = run_encoder(x_emb, mask_f, params)               # (B, S, D) x2

    # num_return_sequences expansion (repeat_interleave on batch axis)
    Bs = batch * num_samples
    k2 = jnp.repeat(k2_b, num_samples, axis=0)                    # (Bs, S, D)
    v2 = jnp.repeat(v2_b, num_samples, axis=0)
    enc_bias = jnp.repeat(((mask_f - 1.0) * 1e9)[:, None, :],
                          num_samples, axis=0)                    # (Bs, 1, S)

    T = prediction_length + 1
    V = N_TOKENS
    dec_tokens0 = jnp.full((Bs, T), PAD_TOKEN_ID, dtype=jnp.int32)

    def step(t, dec_tokens):
        dec_emb = emb[dec_tokens]                                 # (Bs, T, D)
        logits_p = run_decoder_step(t, dec_emb, k2, v2, enc_bias, params)
        logits = logits_p[:, :V] / temperature
        logits = _filter_top_k_top_p(logits, top_k, top_p)
        step_key = jax.random.fold_in(key, t)
        nxt = jax.random.categorical(step_key, logits, axis=-1).astype(jnp.int32)
        return dec_tokens.at[:, t + 1].set(nxt)

    dec_tokens = lax.fori_loop(0, prediction_length, step, dec_tokens0)

    # seq2seq branch of ChronosModel.forward: drop decoder-start token
    preds = dec_tokens[:, 1:]
    return preds.reshape(batch, num_samples, prediction_length)


chronos_forward_jit = jax.jit(
    chronos_forward,
    static_argnames=("prediction_length", "num_samples",
                     "temperature", "top_k", "top_p"))


# --------------------------------- init --------------------------------------
def init_params(key):
    ks = jax.random.split(key, 18)
    s = 0.05
    w = lambda k, shape: jax.random.normal(k, shape, jnp.float32) * s
    D, F, V = D_MODEL, D_FF, N_TOKENS
    lm_head = w(ks[17], (D, V))
    lm_head_p = jnp.pad(lm_head, ((0, 0), (0, V_PAD - V)))   # lane-dense 128 wide
    return dict(
        embedding=w(ks[0], (V, D)),
        enc_wq=w(ks[1], (D, D)), enc_wk=w(ks[2], (D, D)),
        enc_wv=w(ks[3], (D, D)), enc_wo=w(ks[4], (D, D)),
        enc_w1=w(ks[5], (D, F)), enc_w2=w(ks[6], (F, D)),
        dec_swq=w(ks[7], (D, D)), dec_swk=w(ks[8], (D, D)),
        dec_swv=w(ks[9], (D, D)), dec_swo=w(ks[10], (D, D)),
        dec_cwq=w(ks[11], (D, D)), dec_cwk=w(ks[12], (D, D)),
        dec_cwv=w(ks[13], (D, D)), dec_cwo=w(ks[14], (D, D)),
        dec_w1=w(ks[15], (D, F)), dec_w2=w(ks[16], (F, D)),
        lm_head_p=lm_head_p,
    )


if __name__ == "__main__":
    key = jax.random.PRNGKey(0)
    pkey, dkey, skey = jax.random.split(key, 3)
    params = init_params(pkey)

    input_ids = jax.random.randint(
        dkey, (BATCH, SEQ), N_SPECIAL_TOKENS, N_TOKENS, dtype=jnp.int32)
    attention_mask = jnp.ones((BATCH, SEQ), dtype=jnp.int32)

    samples = chronos_forward_jit(
        params, input_ids, attention_mask, skey,
        prediction_length=PRED_LEN, num_samples=NUM_SAMPLES,
        temperature=TEMPERATURE, top_k=TOP_K, top_p=TOP_P)
    samples = jax.block_until_ready(samples)

    assert samples.shape == (BATCH, NUM_SAMPLES, PRED_LEN), samples.shape
    assert samples.dtype == jnp.int32
    assert bool(jnp.all((samples >= 0) & (samples < N_TOKENS)))
    print("KERNEL_OK")
</pallas_src>

<mosaic_0001>
module attributes {stable_mosaic.version = 11 : i64} {
  func.func @decoder_step_kernel(%arg0: i32, %arg1: memref<1xi32, #tpu.memory_space<smem>>, %arg2: memref<2x5x32xf32, #tpu.memory_space<vmem>>, %arg3: memref<2x8x32xf32, #tpu.memory_space<vmem>>, %arg4: memref<2x8x32xf32, #tpu.memory_space<vmem>>, %arg5: memref<2x1x8xf32, #tpu.memory_space<vmem>>, %arg6: memref<32x32xf32, #tpu.memory_space<vmem>>, %arg7: memref<32x32xf32, #tpu.memory_space<vmem>>, %arg8: memref<32x32xf32, #tpu.memory_space<vmem>>, %arg9: memref<32x32xf32, #tpu.memory_space<vmem>>, %arg10: memref<32x32xf32, #tpu.memory_space<vmem>>, %arg11: memref<32x32xf32, #tpu.memory_space<vmem>>, %arg12: memref<32x64xf32, #tpu.memory_space<vmem>>, %arg13: memref<64x32xf32, #tpu.memory_space<vmem>>, %arg14: memref<32x128xf32, #tpu.memory_space<vmem>>, %arg15: memref<2x1x128xf32, #tpu.memory_space<vmem>>) attributes {dimension_semantics = [#tpu.dimension_semantics<parallel>], iteration_bounds = array<i64: 2>, scalar_prefetch = 1 : i64, scratch_operands = 0 : i64, tpu.core_type = #tpu.core_type<tc>, window_params = [{transform_indices = @transform_0, window_bounds = array<i64: 2, 5, 32>}, {transform_indices = @transform_1, window_bounds = array<i64: 2, 8, 32>}, {transform_indices = @transform_2, window_bounds = array<i64: 2, 8, 32>}, {transform_indices = @transform_3, window_bounds = array<i64: 2, 1, 8>}, {pipeline_mode = #tpu.pipeline_mode<synchronous>, transform_indices = @transform_4, window_bounds = array<i64: 32, 32>}, {pipeline_mode = #tpu.pipeline_mode<synchronous>, transform_indices = @transform_5, window_bounds = array<i64: 32, 32>}, {pipeline_mode = #tpu.pipeline_mode<synchronous>, transform_indices = @transform_6, window_bounds = array<i64: 32, 32>}, {pipeline_mode = #tpu.pipeline_mode<synchronous>, transform_indices = @transform_7, window_bounds = array<i64: 32, 32>}, {pipeline_mode = #tpu.pipeline_mode<synchronous>, transform_indices = @transform_8, window_bounds = array<i64: 32, 32>}, {pipeline_mode = #tpu.pipeline_mode<synchronous>, transform_indices = @transform_9, window_bounds = array<i64: 32, 32>}, {pipeline_mode = #tpu.pipeline_mode<synchronous>, transform_indices = @transform_10, window_bounds = array<i64: 32, 64>}, {pipeline_mode = #tpu.pipeline_mode<synchronous>, transform_indices = @transform_11, window_bounds = array<i64: 64, 32>}, {pipeline_mode = #tpu.pipeline_mode<synchronous>, transform_indices = @transform_12, window_bounds = array<i64: 32, 128>}, {transform_indices = @transform_13, window_bounds = array<i64: 2, 1, 128>}]} {
    %c0 = arith.constant 0 : index
    %0 = memref.load %arg1[%c0] : memref<1xi32, #tpu.memory_space<smem>>
    %c0_0 = arith.constant 0 : index
    %c0_1 = arith.constant 0 : index
    %c0_2 = arith.constant 0 : index
    %1 = vector.load %arg2[%c0_0, %c0_1, %c0_2] : memref<2x5x32xf32, #tpu.memory_space<vmem>>, vector<2x5x32xf32>
    %2 = arith.mulf %1, %1 : vector<2x5x32xf32>
    %cst = arith.constant dense<0.000000e+00> : vector<2x5xf32>
    %3 = vector.multi_reduction <add>, %2, %cst [2] : vector<2x5x32xf32> to vector<2x5xf32>
    %4 = vector.shape_cast %3 : vector<2x5xf32> to vector<2x5x1xf32>
    %cst_3 = arith.constant 3.200000e+01 : f32
    %5 = vector.broadcast %cst_3 : f32 to vector<2x5x1xf32>
    %6 = arith.divf %4, %5 : vector<2x5x1xf32>
    %cst_4 = arith.constant 9.99999997E-7 : f32
    %7 = vector.broadcast %cst_4 : f32 to vector<2x5x1xf32>
    %8 = arith.addf %6, %7 : vector<2x5x1xf32>
    %9 = math.rsqrt %8 : vector<2x5x1xf32>
    %10 = vector.broadcast %9 : vector<2x5x1xf32> to vector<2x5x32xf32>
    %11 = arith.mulf %1, %10 : vector<2x5x32xf32>
    %12 = vector.shape_cast %11 : vector<2x5x32xf32> to vector<10x32xf32>
    %c0_5 = arith.constant 0 : index
    %c0_6 = arith.constant 0 : index
    %13 = vector.load %arg7[%c0_5, %c0_6] : memref<32x32xf32, #tpu.memory_space<vmem>>, vector<32x32xf32>
    %cst_7 = arith.constant dense<0.000000e+00> : vector<10x32xf32>
    %14 = tpu.matmul %12, %13, %cst_7 {dimension_numbers = #tpu.dot_dimension_numbers<[1], [0], [0], [1], [0, 0, 1, 1], [], []>} : vector<10x32xf32>, vector<32x32xf32>, vector<10x32xf32> -> vector<10x32xf32>
    %15 = vector.shape_cast %14 : vector<10x32xf32> to vector<2x5x32xf32>
    %c0_8 = arith.constant 0 : index
    %c0_9 = arith.constant 0 : index
    %16 = vector.load %arg8[%c0_8, %c0_9] : memref<32x32xf32, #tpu.memory_space<vmem>>, vector<32x32xf32>
    %cst_10 = arith.constant dense<0.000000e+00> : vector<10x32xf32>
    %17 = tpu.matmul %12, %16, %cst_10 {dimension_numbers = #tpu.dot_dimension_numbers<[1], [0], [0], [1], [0, 0, 1, 1], [], []>} : vector<10x32xf32>, vector<32x32xf32>, vector<10x32xf32> -> vector<10x32xf32>
    %18 = vector.shape_cast %17 : vector<10x32xf32> to vector<2x5x32xf32>
    %c0_11 = arith.constant 0 : index
    %19 = arith.index_cast %0 : i32 to index
    %c0_12 = arith.constant 0 : index
    %20 = vector.load %arg2[%c0_11, %19, %c0_12] : memref<2x5x32xf32, #tpu.memory_space<vmem>>, vector<2x1x32xf32>
    %21 = vector.shape_cast %20 : vector<2x1x32xf32> to vector<2x32xf32>
    %22 = arith.mulf %21, %21 : vector<2x32xf32>
    %cst_13 = arith.constant dense<0.000000e+00> : vector<2xf32>
    %23 = vector.multi_reduction <add>, %22, %cst_13 [1] : vector<2x32xf32> to vector<2xf32>
    %24 = vector.shape_cast %23 : vector<2xf32> to vector<2x1xf32>
    %cst_14 = arith.constant 3.200000e+01 : f32
    %25 = vector.broadcast %cst_14 : f32 to vector<2x1xf32>
    %26 = arith.divf %24, %25 : vector<2x1xf32>
    %cst_15 = arith.constant 9.99999997E-7 : f32
    %27 = vector.broadcast %cst_15 : f32 to vector<2x1xf32>
    %28 = arith.addf %26, %27 : vector<2x1xf32>
    %29 = math.rsqrt %28 : vector<2x1xf32>
    %30 = vector.broadcast %29 : vector<2x1xf32> to vector<2x32xf32>
    %31 = arith.mulf %21, %30 : vector<2x32xf32>
    %c0_16 = arith.constant 0 : index
    %c0_17 = arith.constant 0 : index
    %32 = vector.load %arg6[%c0_16, %c0_17] : memref<32x32xf32, #tpu.memory_space<vmem>>, vector<32x32xf32>
    %cst_18 = arith.constant dense<0.000000e+00> : vector<2x32xf32>
    %33 = tpu.matmul %31, %32, %cst_18 {dimension_numbers = #tpu.dot_dimension_numbers<[1], [0], [0], [1], [0, 0, 1, 1], [], []>} : vector<2x32xf32>, vector<32x32xf32>, vector<2x32xf32> -> vector<2x32xf32>
    %34 = vector.shape_cast %33 : vector<2x32xf32> to vector<2x1x32xf32>
    "tpu.trace_start"() <{level = 10 : i32, message = "bqd,bkd->bqk"}> : () -> ()
    %cst_19 = arith.constant dense<0.000000e+00> : vector<2x1x5xf32>
    %35 = tpu.matmul %34, %15, %cst_19 {dimension_numbers = #tpu.dot_dimension_numbers<[2], [2], [1], [1], [0, 0, 0, 1, 1, 1], [0], [0]>} : vector<2x1x32xf32>, vector<2x5x32xf32>, vector<2x1x5xf32> -> vector<2x1x5xf32>
    "tpu.trace_stop"() : () -> ()
    %cst_20 = arith.constant 0.176776692 : f32
    %36 = vector.broadcast %cst_20 : f32 to vector<2x1x5xf32>
    %37 = arith.mulf %35, %36 : vector<2x1x5xf32>
    %38 = tpu.iota {dimensions = array<i32: 2>} : vector<2x1x5xi32>
    %39 = vector.broadcast %0 : i32 to vector<2x1x5xi32>
    %40 = arith.cmpi sle, %38, %39 : vector<2x1x5xi32>
    %cst_21 = arith.constant -1.000000e+09 : f32
    %41 = vector.broadcast %cst_21 : f32 to vector<2x1x5xf32>
    %42 = arith.select %40, %37, %41 : vector<2x1x5xi1>, vector<2x1x5xf32>
    %cst_22 = arith.constant dense<0xFF800000> : vector<2x1xf32>
    %43 = vector.multi_reduction <maximumf>, %42, %cst_22 [2] : vector<2x1x5xf32> to vector<2x1xf32>
    %cst_23 = arith.constant 0xFF800000 : f32
    %44 = vector.broadcast %cst_23 : f32 to vector<2x1xf32>
    %45 = arith.maximumf %44, %43 : vector<2x1xf32>
    %46 = vector.shape_cast %45 : vector<2x1xf32> to vector<2x1x1xf32>
    %47 = vector.broadcast %46 : vector<2x1x1xf32> to vector<2x1x5xf32>
    %48 = arith.subf %42, %47 : vector<2x1x5xf32>
    %49 = math.exp %48 : vector<2x1x5xf32>
    %cst_24 = arith.constant dense<0.000000e+00> : vector<2x1xf32>
    %50 = vector.multi_reduction <add>, %49, %cst_24 [2] : vector<2x1x5xf32> to vector<2x1xf32>
    %51 = vector.shape_cast %50 : vector<2x1xf32> to vector<2x1x1xf32>
    %52 = vector.broadcast %51 : vector<2x1x1xf32> to vector<2x1x5xf32>
    %53 = arith.divf %49, %52 : vector<2x1x5xf32>
    "tpu.trace_start"() <{level = 10 : i32, message = "bqk,bkd->bqd"}> : () -> ()
    %cst_25 = arith.constant dense<0.000000e+00> : vector<2x1x32xf32>
    %54 = tpu.matmul %53, %18, %cst_25 {dimension_numbers = #tpu.dot_dimension_numbers<[2], [1], [1], [2], [0, 0, 0, 1, 1, 2], [0], [0]>} : vector<2x1x5xf32>, vector<2x5x32xf32>, vector<2x1x32xf32> -> vector<2x1x32xf32>
    "tpu.trace_stop"() : () -> ()
    %55 = vector.shape_cast %54 : vector<2x1x32xf32> to vector<2x32xf32>
    %c0_26 = arith.constant 0 : index
    %c0_27 = arith.constant 0 : index
    %56 = vector.load %arg9[%c0_26, %c0_27] : memref<32x32xf32, #tpu.memory_space<vmem>>, vector<32x32xf32>
    %cst_28 = arith.constant dense<0.000000e+00> : vector<2x32xf32>
    %57 = tpu.matmul %55, %56, %cst_28 {dimension_numbers = #tpu.dot_dimension_numbers<[1], [0], [0], [1], [0, 0, 1, 1], [], []>} : vector<2x32xf32>, vector<32x32xf32>, vector<2x32xf32> -> vector<2x32xf32>
    %58 = arith.addf %21, %57 : vector<2x32xf32>
    %59 = arith.mulf %58, %58 : vector<2x32xf32>
    %cst_29 = arith.constant dense<0.000000e+00> : vector<2xf32>
    %60 = vector.multi_reduction <add>, %59, %cst_29 [1] : vector<2x32xf32> to vector<2xf32>
    %61 = vector.shape_cast %60 : vector<2xf32> to vector<2x1xf32>
    %cst_30 = arith.constant 3.200000e+01 : f32
    %62 = vector.broadcast %cst_30 : f32 to vector<2x1xf32>
    %63 = arith.divf %61, %62 : vector<2x1xf32>
    %cst_31 = arith.constant 9.99999997E-7 : f32
    %64 = vector.broadcast %cst_31 : f32 to vector<2x1xf32>
    %65 = arith.addf %63, %64 : vector<2x1xf32>
    %66 = math.rsqrt %65 : vector<2x1xf32>
    %67 = vector.broadcast %66 : vector<2x1xf32> to vector<2x32xf32>
    %68 = arith.mulf %58, %67 : vector<2x32xf32>
    %c0_32 = arith.constant 0 : index
    %c0_33 = arith.constant 0 : index
    %69 = vector.load %arg10[%c0_32, %c0_33] : memref<32x32xf32, #tpu.memory_space<vmem>>, vector<32x32xf32>
    %cst_34 = arith.constant dense<0.000000e+00> : vector<2x32xf32>
    %70 = tpu.matmul %68, %69, %cst_34 {dimension_numbers = #tpu.dot_dimension_numbers<[1], [0], [0], [1], [0, 0, 1, 1], [], []>} : vector<2x32xf32>, vector<32x32xf32>, vector<2x32xf32> -> vector<2x32xf32>
    %71 = vector.shape_cast %70 : vector<2x32xf32> to vector<2x1x32xf32>
    %c0_35 = arith.constant 0 : index
    %c0_36 = arith.constant 0 : index
    %c0_37 = arith.constant 0 : index
    %72 = vector.load %arg3[%c0_35, %c0_36, %c0_37] : memref<2x8x32xf32, #tpu.memory_space<vmem>>, vector<2x8x32xf32>
    "tpu.trace_start"() <{level = 10 : i32, message = "bqd,bkd->bqk"}> : () -> ()
    %cst_38 = arith.constant dense<0.000000e+00> : vector<2x1x8xf32>
    %73 = tpu.matmul %71, %72, %cst_38 {dimension_numbers = #tpu.dot_dimension_numbers<[2], [2], [1], [1], [0, 0, 0, 1, 1, 1], [0], [0]>} : vector<2x1x32xf32>, vector<2x8x32xf32>, vector<2x1x8xf32> -> vector<2x1x8xf32>
    "tpu.trace_stop"() : () -> ()
    %cst_39 = arith.constant 0.176776692 : f32
    %74 = vector.broadcast %cst_39 : f32 to vector<2x1x8xf32>
    %75 = arith.mulf %73, %74 : vector<2x1x8xf32>
    %c0_40 = arith.constant 0 : index
    %c0_41 = arith.constant 0 : index
    %c0_42 = arith.constant 0 : index
    %76 = vector.load %arg5[%c0_40, %c0_41, %c0_42] : memref<2x1x8xf32, #tpu.memory_space<vmem>>, vector<2x1x8xf32>
    %77 = arith.addf %75, %76 : vector<2x1x8xf32>
    %cst_43 = arith.constant dense<0xFF800000> : vector<2x1xf32>
    %78 = vector.multi_reduction <maximumf>, %77, %cst_43 [2] : vector<2x1x8xf32> to vector<2x1xf32>
    %cst_44 = arith.constant 0xFF800000 : f32
    %79 = vector.broadcast %cst_44 : f32 to vector<2x1xf32>
    %80 = arith.maximumf %79, %78 : vector<2x1xf32>
    %81 = vector.shape_cast %80 : vector<2x1xf32> to vector<2x1x1xf32>
    %82 = vector.broadcast %81 : vector<2x1x1xf32> to vector<2x1x8xf32>
    %83 = arith.subf %77, %82 : vector<2x1x8xf32>
    %84 = math.exp %83 : vector<2x1x8xf32>
    %cst_45 = arith.constant dense<0.000000e+00> : vector<2x1xf32>
    %85 = vector.multi_reduction <add>, %84, %cst_45 [2] : vector<2x1x8xf32> to vector<2x1xf32>
    %86 = vector.shape_cast %85 : vector<2x1xf32> to vector<2x1x1xf32>
    %87 = vector.broadcast %86 : vector<2x1x1xf32> to vector<2x1x8xf32>
    %88 = arith.divf %84, %87 : vector<2x1x8xf32>
    %c0_46 = arith.constant 0 : index
    %c0_47 = arith.constant 0 : index
    %c0_48 = arith.constant 0 : index
    %89 = vector.load %arg4[%c0_46, %c0_47, %c0_48] : memref<2x8x32xf32, #tpu.memory_space<vmem>>, vector<2x8x32xf32>
    "tpu.trace_start"() <{level = 10 : i32, message = "bqk,bkd->bqd"}> : () -> ()
    %cst_49 = arith.constant dense<0.000000e+00> : vector<2x1x32xf32>
    %90 = tpu.matmul %88, %89, %cst_49 {dimension_numbers = #tpu.dot_dimension_numbers<[2], [1], [1], [2], [0, 0, 0, 1, 1, 2], [0], [0]>} : vector<2x1x8xf32>, vector<2x8x32xf32>, vector<2x1x32xf32> -> vector<2x1x32xf32>
    "tpu.trace_stop"() : () -> ()
    %91 = vector.shape_cast %90 : vector<2x1x32xf32> to vector<2x32xf32>
    %c0_50 = arith.constant 0 : index
    %c0_51 = arith.constant 0 : index
    %92 = vector.load %arg11[%c0_50, %c0_51] : memref<32x32xf32, #tpu.memory_space<vmem>>, vector<32x32xf32>
    %cst_52 = arith.constant dense<0.000000e+00> : vector<2x32xf32>
    %93 = tpu.matmul %91, %92, %cst_52 {dimension_numbers = #tpu.dot_dimension_numbers<[1], [0], [0], [1], [0, 0, 1, 1], [], []>} : vector<2x32xf32>, vector<32x32xf32>, vector<2x32xf32> -> vector<2x32xf32>
    %94 = arith.addf %58, %93 : vector<2x32xf32>
    %95 = arith.mulf %94, %94 : vector<2x32xf32>
    %cst_53 = arith.constant dense<0.000000e+00> : vector<2xf32>
    %96 = vector.multi_reduction <add>, %95, %cst_53 [1] : vector<2x32xf32> to vector<2xf32>
    %97 = vector.shape_cast %96 : vector<2xf32> to vector<2x1xf32>
    %cst_54 = arith.constant 3.200000e+01 : f32
    %98 = vector.broadcast %cst_54 : f32 to vector<2x1xf32>
    %99 = arith.divf %97, %98 : vector<2x1xf32>
    %cst_55 = arith.constant 9.99999997E-7 : f32
    %100 = vector.broadcast %cst_55 : f32 to vector<2x1xf32>
    %101 = arith.addf %99, %100 : vector<2x1xf32>
    %102 = math.rsqrt %101 : vector<2x1xf32>
    %103 = vector.broadcast %102 : vector<2x1xf32> to vector<2x32xf32>
    %104 = arith.mulf %94, %103 : vector<2x32xf32>
    %c0_56 = arith.constant 0 : index
    %c0_57 = arith.constant 0 : index
    %105 = vector.load %arg12[%c0_56, %c0_57] : memref<32x64xf32, #tpu.memory_space<vmem>>, vector<32x64xf32>
    %cst_58 = arith.constant dense<0.000000e+00> : vector<2x64xf32>
    %106 = tpu.matmul %104, %105, %cst_58 {dimension_numbers = #tpu.dot_dimension_numbers<[1], [0], [0], [1], [0, 0, 1, 1], [], []>} : vector<2x32xf32>, vector<32x64xf32>, vector<2x64xf32> -> vector<2x64xf32>
    %cst_59 = arith.constant 0.000000e+00 : f32
    %107 = vector.broadcast %cst_59 : f32 to vector<2x64xf32>
    %108 = arith.maximumf %106, %107 : vector<2x64xf32>
    %c0_60 = arith.constant 0 : index
    %c0_61 = arith.constant 0 : index
    %109 = vector.load %arg13[%c0_60, %c0_61] : memref<64x32xf32, #tpu.memory_space<vmem>>, vector<64x32xf32>
    %cst_62 = arith.constant dense<0.000000e+00> : vector<2x32xf32>
    %110 = tpu.matmul %108, %109, %cst_62 {dimension_numbers = #tpu.dot_dimension_numbers<[1], [0], [0], [1], [0, 0, 1, 1], [], []>} : vector<2x64xf32>, vector<64x32xf32>, vector<2x32xf32> -> vector<2x32xf32>
    %111 = arith.addf %94, %110 : vector<2x32xf32>
    %112 = arith.mulf %111, %111 : vector<2x32xf32>
    %cst_63 = arith.constant dense<0.000000e+00> : vector<2xf32>
    %113 = vector.multi_reduction <add>, %112, %cst_63 [1] : vector<2x32xf32> to vector<2xf32>
    %114 = vector.shape_cast %113 : vector<2xf32> to vector<2x1xf32>
    %cst_64 = arith.constant 3.200000e+01 : f32
    %115 = vector.broadcast %cst_64 : f32 to vector<2x1xf32>
    %116 = arith.divf %114, %115 : vector<2x1xf32>
    %cst_65 = arith.constant 9.99999997E-7 : f32
    %117 = vector.broadcast %cst_65 : f32 to vector<2x1xf32>
    %118 = arith.addf %116, %117 : vector<2x1xf32>
    %119 = math.rsqrt %118 : vector<2x1xf32>
    %120 = vector.broadcast %119 : vector<2x1xf32> to vector<2x32xf32>
    %121 = arith.mulf %111, %120 : vector<2x32xf32>
    %c0_66 = arith.constant 0 : index
    %c0_67 = arith.constant 0 : index
    %122 = vector.load %arg14[%c0_66, %c0_67] : memref<32x128xf32, #tpu.memory_space<vmem>>, vector<32x128xf32>
    %cst_68 = arith.constant dense<0.000000e+00> : vector<2x128xf32>
    %123 = tpu.matmul %121, %122, %cst_68 {dimension_numbers = #tpu.dot_dimension_numbers<[1], [0], [0], [1], [0, 0, 1, 1], [], []>} : vector<2x32xf32>, vector<32x128xf32>, vector<2x128xf32> -> vector<2x128xf32>
    %124 = vector.shape_cast %123 : vector<2x128xf32> to vector<2x1x128xf32>
    %c0_69 = arith.constant 0 : index
    %c0_70 = arith.constant 0 : index
    %c0_71 = arith.constant 0 : index
    %125 = vector.load %arg15[%c0_69, %c0_70, %c0_71] : memref<2x1x128xf32, #tpu.memory_space<vmem>>, vector<2x1x128xf32>
    tpu.vector_store %arg15[%c0_69, %c0_70, %c0_71], %124 {strides = array<i32>} : memref<2x1x128xf32, #tpu.memory_space<vmem>>, vector<2x1x128xf32>,
    return
  }
  func.func @transform_0(%arg0: i32, %arg1: memref<1xi32, #tpu.memory_space<smem>>) -> (i32, i32, i32) {
    %c0_i32 = arith.constant 0 : i32
    %c0_i32_0 = arith.constant 0 : i32
    %c0_i32_1 = arith.constant 0 : i32
    return %arg0, %c0_i32, %c0_i32_0 : i32, i32, i32
  }
  func.func @transform_1(%arg0: i32, %arg1: memref<1xi32, #tpu.memory_space<smem>>) -> (i32, i32, i32) {
    %c0_i32 = arith.constant 0 : i32
    %c0_i32_0 = arith.constant 0 : i32
    %c0_i32_1 = arith.constant 0 : i32
    return %arg0, %c0_i32, %c0_i32_0 : i32, i32, i32
  }
  func.func @transform_2(%arg0: i32, %arg1: memref<1xi32, #tpu.memory_space<smem>>) -> (i32, i32, i32) {
    %c0_i32 = arith.constant 0 : i32
    %c0_i32_0 = arith.constant 0 : i32
    %c0_i32_1 = arith.constant 0 : i32
    return %arg0, %c0_i32, %c0_i32_0 : i32, i32, i32
  }
  func.func @transform_3(%arg0: i32, %arg1: memref<1xi32, #tpu.memory_space<smem>>) -> (i32, i32, i32) {
    %c0_i32 = arith.constant 0 : i32
    %c0_i32_0 = arith.constant 0 : i32
    %c0_i32_1 = arith.constant 0 : i32
    return %arg0, %c0_i32, %c0_i32_0 : i32, i32, i32
  }
  func.func @transform_4(%arg0: i32, %arg1: memref<1xi32, #tpu.memory_space<smem>>) -> (i32, i32) {
    %c0_i32 = arith.constant 0 : i32
    %c0_i32_0 = arith.constant 0 : i32
    %c0_i32_1 = arith.constant 0 : i32
    return %c0_i32, %c0_i32_0 : i32, i32
  }
  func.func @transform_5(%arg0: i32, %arg1: memref<1xi32, #tpu.memory_space<smem>>) -> (i32, i32) {
    %c0_i32 = arith.constant 0 : i32
    %c0_i32_0 = arith.constant 0 : i32
    %c0_i32_1 = arith.constant 0 : i32
    return %c0_i32, %c0_i32_0 : i32, i32
  }
  func.func @transform_6(%arg0: i32, %arg1: memref<1xi32, #tpu.memory_space<smem>>) -> (i32, i32) {
    %c0_i32 = arith.constant 0 : i32
    %c0_i32_0 = arith.constant 0 : i32
    %c0_i32_1 = arith.constant 0 : i32
    return %c0_i32, %c0_i32_0 : i32, i32
  }
  func.func @transform_7(%arg0: i32, %arg1: memref<1xi32, #tpu.memory_space<smem>>) -> (i32, i32) {
    %c0_i32 = arith.constant 0 : i32
    %c0_i32_0 = arith.constant 0 : i32
    %c0_i32_1 = arith.constant 0 : i32
    return %c0_i32, %c0_i32_0 : i32, i32
  }
  func.func @transform_8(%arg0: i32, %arg1: memref<1xi32, #tpu.memory_space<smem>>) -> (i32, i32) {
    %c0_i32 = arith.constant 0 : i32
    %c0_i32_0 = arith.constant 0 : i32
    %c0_i32_1 = arith.constant 0 : i32
    return %c0_i32, %c0_i32_0 : i32, i32
  }
  func.func @transform_9(%arg0: i32, %arg1: memref<1xi32, #tpu.memory_space<smem>>) -> (i32, i32) {
    %c0_i32 = arith.constant 0 : i32
    %c0_i32_0 = arith.constant 0 : i32
    %c0_i32_1 = arith.constant 0 : i32
    return %c0_i32, %c0_i32_0 : i32, i32
  }
  func.func @transform_10(%arg0: i32, %arg1: memref<1xi32, #tpu.memory_space<smem>>) -> (i32, i32) {
    %c0_i32 = arith.constant 0 : i32
    %c0_i32_0 = arith.constant 0 : i32
    %c0_i32_1 = arith.constant 0 : i32
    return %c0_i32, %c0_i32_0 : i32, i32
  }
  func.func @transform_11(%arg0: i32, %arg1: memref<1xi32, #tpu.memory_space<smem>>) -> (i32, i32) {
    %c0_i32 = arith.constant 0 : i32
    %c0_i32_0 = arith.constant 0 : i32
    %c0_i32_1 = arith.constant 0 : i32
    return %c0_i32, %c0_i32_0 : i32, i32
  }
  func.func @transform_12(%arg0: i32, %arg1: memref<1xi32, #tpu.memory_space<smem>>) -> (i32, i32) {
    %c0_i32 = arith.constant 0 : i32
    %c0_i32_0 = arith.constant 0 : i32
    %c0_i32_1 = arith.constant 0 : i32
    return %c0_i32, %c0_i32_0 : i32, i32
  }
  func.func @transform_13(%arg0: i32, %arg1: memref<1xi32, #tpu.memory_space<smem>>) -> (i32, i32, i32) {
    %c0_i32 = arith.constant 0 : i32
    %c0_i32_0 = arith.constant 0 : i32
    %c0_i32_1 = arith.constant 0 : i32
    return %arg0, %c0_i32, %c0_i32_0 : i32, i32, i32
  }
}

module attributes {stable_mosaic.version = 11 : i64} {
  func.func @encoder_kernel(%arg0: i32, %arg1: memref<2x8x32xf32, #tpu.memory_space<vmem>>, %arg2: memref<2x8xf32, #tpu.memory_space<vmem>>, %arg3: memref<32x32xf32, #tpu.memory_space<vmem>>, %arg4: memref<32x32xf32, #tpu.memory_space<vmem>>, %arg5: memref<32x32xf32, #tpu.memory_space<vmem>>, %arg6: memref<32x32xf32, #tpu.memory_space<vmem>>, %arg7: memref<32x64xf32, #tpu.memory_space<vmem>>, %arg8: memref<64x32xf32, #tpu.memory_space<vmem>>, %arg9: memref<32x32xf32, #tpu.memory_space<vmem>>, %arg10: memref<32x32xf32, #tpu.memory_space<vmem>>, %arg11: memref<2x8x32xf32, #tpu.memory_space<vmem>>, %arg12: memref<2x8x32xf32, #tpu.memory_space<vmem>>) attributes {dimension_semantics = [#tpu.dimension_semantics<arbitrary>], iteration_bounds = array<i64: 1>, scalar_prefetch = 0 : i64, scratch_operands = 0 : i64, tpu.core_type = #tpu.core_type<tc>, window_params = [{pipeline_mode = #tpu.pipeline_mode<synchronous>, transform_indices = @transform_0, window_bounds = array<i64: 2, 8, 32>}, {pipeline_mode = #tpu.pipeline_mode<synchronous>, transform_indices = @transform_1, window_bounds = array<i64: 2, 8>}, {pipeline_mode = #tpu.pipeline_mode<synchronous>, transform_indices = @transform_2, window_bounds = array<i64: 32, 32>}, {pipeline_mode = #tpu.pipeline_mode<synchronous>, transform_indices = @transform_3, window_bounds = array<i64: 32, 32>}, {pipeline_mode = #tpu.pipeline_mode<synchronous>, transform_indices = @transform_4, window_bounds = array<i64: 32, 32>}, {pipeline_mode = #tpu.pipeline_mode<synchronous>, transform_indices = @transform_5, window_bounds = array<i64: 32, 32>}, {pipeline_mode = #tpu.pipeline_mode<synchronous>, transform_indices = @transform_6, window_bounds = array<i64: 32, 64>}, {pipeline_mode = #tpu.pipeline_mode<synchronous>, transform_indices = @transform_7, window_bounds = array<i64: 64, 32>}, {pipeline_mode = #tpu.pipeline_mode<synchronous>, transform_indices = @transform_8, window_bounds = array<i64: 32, 32>}, {pipeline_mode = #tpu.pipeline_mode<synchronous>, transform_indices = @transform_9, window_bounds = array<i64: 32, 32>}, {pipeline_mode = #tpu.pipeline_mode<synchronous>, transform_indices = @transform_10, window_bounds = array<i64: 2, 8, 32>}, {pipeline_mode = #tpu.pipeline_mode<synchronous>, transform_indices = @transform_11, window_bounds = array<i64: 2, 8, 32>}]} {
    %c0 = arith.constant 0 : index
    %c0_0 = arith.constant 0 : index
    %c0_1 = arith.constant 0 : index
    %0 = vector.load %arg1[%c0, %c0_0, %c0_1] : memref<2x8x32xf32, #tpu.memory_space<vmem>>, vector<2x8x32xf32>
    %c0_2 = arith.constant 0 : index
    %c0_3 = arith.constant 0 : index
    %1 = vector.load %arg2[%c0_2, %c0_3] : memref<2x8xf32, #tpu.memory_space<vmem>>, vector<2x8xf32>
    %cst = arith.constant 1.000000e+00 : f32
    %2 = vector.broadcast %cst : f32 to vector<2x8xf32>
    %3 = arith.subf %1, %2 : vector<2x8xf32>
    %cst_4 = arith.constant 1.000000e+09 : f32
    %4 = vector.broadcast %cst_4 : f32 to vector<2x8xf32>
    %5 = arith.mulf %3, %4 : vector<2x8xf32>
    %6 = arith.mulf %0, %0 : vector<2x8x32xf32>
    %cst_5 = arith.constant dense<0.000000e+00> : vector<2x8xf32>
    %7 = vector.multi_reduction <add>, %6, %cst_5 [2] : vector<2x8x32xf32> to vector<2x8xf32>
    %8 = vector.shape_cast %7 : vector<2x8xf32> to vector<2x8x1xf32>
    %cst_6 = arith.constant 3.200000e+01 : f32
    %9 = vector.broadcast %cst_6 : f32 to vector<2x8x1xf32>
    %10 = arith.divf %8, %9 : vector<2x8x1xf32>
    %cst_7 = arith.constant 9.99999997E-7 : f32
    %11 = vector.broadcast %cst_7 : f32 to vector<2x8x1xf32>
    %12 = arith.addf %10, %11 : vector<2x8x1xf32>
    %13 = math.rsqrt %12 : vector<2x8x1xf32>
    %14 = vector.broadcast %13 : vector<2x8x1xf32> to vector<2x8x32xf32>
    %15 = arith.mulf %0, %14 : vector<2x8x32xf32>
    %16 = vector.shape_cast %15 : vector<2x8x32xf32> to vector<16x32xf32>
    %c0_8 = arith.constant 0 : index
    %c0_9 = arith.constant 0 : index
    %17 = vector.load %arg3[%c0_8, %c0_9] : memref<32x32xf32, #tpu.memory_space<vmem>>, vector<32x32xf32>
    %cst_10 = arith.constant dense<0.000000e+00> : vector<16x32xf32>
    %18 = tpu.matmul %16, %17, %cst_10 {dimension_numbers = #tpu.dot_dimension_numbers<[1], [0], [0], [1], [0, 0, 1, 1], [], []>} : vector<16x32xf32>, vector<32x32xf32>, vector<16x32xf32> -> vector<16x32xf32>
    %19 = vector.shape_cast %18 : vector<16x32xf32> to vector<2x8x32xf32>
    %c0_11 = arith.constant 0 : index
    %c0_12 = arith.constant 0 : index
    %20 = vector.load %arg4[%c0_11, %c0_12] : memref<32x32xf32, #tpu.memory_space<vmem>>, vector<32x32xf32>
    %cst_13 = arith.constant dense<0.000000e+00> : vector<16x32xf32>
    %21 = tpu.matmul %16, %20, %cst_13 {dimension_numbers = #tpu.dot_dimension_numbers<[1], [0], [0], [1], [0, 0, 1, 1], [], []>} : vector<16x32xf32>, vector<32x32xf32>, vector<16x32xf32> -> vector<16x32xf32>
    %22 = vector.shape_cast %21 : vector<16x32xf32> to vector<2x8x32xf32>
    %c0_14 = arith.constant 0 : index
    %c0_15 = arith.constant 0 : index
    %23 = vector.load %arg5[%c0_14, %c0_15] : memref<32x32xf32, #tpu.memory_space<vmem>>, vector<32x32xf32>
    %cst_16 = arith.constant dense<0.000000e+00> : vector<16x32xf32>
    %24 = tpu.matmul %16, %23, %cst_16 {dimension_numbers = #tpu.dot_dimension_numbers<[1], [0], [0], [1], [0, 0, 1, 1], [], []>} : vector<16x32xf32>, vector<32x32xf32>, vector<16x32xf32> -> vector<16x32xf32>
    %25 = vector.shape_cast %24 : vector<16x32xf32> to vector<2x8x32xf32>
    "tpu.trace_start"() <{level = 10 : i32, message = "bqd,bkd->bqk"}> : () -> ()
    %cst_17 = arith.constant dense<0.000000e+00> : vector<2x8x8xf32>
    %26 = tpu.matmul %19, %22, %cst_17 {dimension_numbers = #tpu.dot_dimension_numbers<[2], [2], [1], [1], [0, 0, 0, 1, 1, 1], [0], [0]>} : vector<2x8x32xf32>, vector<2x8x32xf32>, vector<2x8x8xf32> -> vector<2x8x8xf32>
    "tpu.trace_stop"() : () -> ()
    %cst_18 = arith.constant 0.176776692 : f32
    %27 = vector.broadcast %cst_18 : f32 to vector<2x8x8xf32>
    %28 = arith.mulf %26, %27 : vector<2x8x8xf32>
    %29 = vector.shape_cast %5 : vector<2x8xf32> to vector<2x1x8xf32>
    %30 = vector.broadcast %29 : vector<2x1x8xf32> to vector<2x8x8xf32>
    %31 = arith.addf %28, %30 : vector<2x8x8xf32>
    %cst_19 = arith.constant dense<0xFF800000> : vector<2x8xf32>
    %32 = vector.multi_reduction <maximumf>, %31, %cst_19 [2] : vector<2x8x8xf32> to vector<2x8xf32>
    %cst_20 = arith.constant 0xFF800000 : f32
    %33 = vector.broadcast %cst_20 : f32 to vector<2x8xf32>
    %34 = arith.maximumf %33, %32 : vector<2x8xf32>
    %35 = vector.shape_cast %34 : vector<2x8xf32> to vector<2x8x1xf32>
    %36 = vector.broadcast %35 : vector<2x8x1xf32> to vector<2x8x8xf32>
    %37 = arith.subf %31, %36 : vector<2x8x8xf32>
    %38 = math.exp %37 : vector<2x8x8xf32>
    %cst_21 = arith.constant dense<0.000000e+00> : vector<2x8xf32>
    %39 = vector.multi_reduction <add>, %38, %cst_21 [2] : vector<2x8x8xf32> to vector<2x8xf32>
    %40 = vector.shape_cast %39 : vector<2x8xf32> to vector<2x8x1xf32>
    %41 = vector.broadcast %40 : vector<2x8x1xf32> to vector<2x8x8xf32>
    %42 = arith.divf %38, %41 : vector<2x8x8xf32>
    "tpu.trace_start"() <{level = 10 : i32, message = "bqk,bkd->bqd"}> : () -> ()
    %cst_22 = arith.constant dense<0.000000e+00> : vector<2x8x32xf32>
    %43 = tpu.matmul %42, %25, %cst_22 {dimension_numbers = #tpu.dot_dimension_numbers<[2], [1], [1], [2], [0, 0, 0, 1, 1, 2], [0], [0]>} : vector<2x8x8xf32>, vector<2x8x32xf32>, vector<2x8x32xf32> -> vector<2x8x32xf32>
    "tpu.trace_stop"() : () -> ()
    %44 = vector.shape_cast %43 : vector<2x8x32xf32> to vector<16x32xf32>
    %c0_23 = arith.constant 0 : index
    %c0_24 = arith.constant 0 : index
    %45 = vector.load %arg6[%c0_23, %c0_24] : memref<32x32xf32, #tpu.memory_space<vmem>>, vector<32x32xf32>
    %cst_25 = arith.constant dense<0.000000e+00> : vector<16x32xf32>
    %46 = tpu.matmul %44, %45, %cst_25 {dimension_numbers = #tpu.dot_dimension_numbers<[1], [0], [0], [1], [0, 0, 1, 1], [], []>} : vector<16x32xf32>, vector<32x32xf32>, vector<16x32xf32> -> vector<16x32xf32>
    %47 = vector.shape_cast %46 : vector<16x32xf32> to vector<2x8x32xf32>
    %48 = arith.addf %0, %47 : vector<2x8x32xf32>
    %49 = arith.mulf %48, %48 : vector<2x8x32xf32>
    %cst_26 = arith.constant dense<0.000000e+00> : vector<2x8xf32>
    %50 = vector.multi_reduction <add>, %49, %cst_26 [2] : vector<2x8x32xf32> to vector<2x8xf32>
    %51 = vector.shape_cast %50 : vector<2x8xf32> to vector<2x8x1xf32>
    %cst_27 = arith.constant 3.200000e+01 : f32
    %52 = vector.broadcast %cst_27 : f32 to vector<2x8x1xf32>
    %53 = arith.divf %51, %52 : vector<2x8x1xf32>
    %cst_28 = arith.constant 9.99999997E-7 : f32
    %54 = vector.broadcast %cst_28 : f32 to vector<2x8x1xf32>
    %55 = arith.addf %53, %54 : vector<2x8x1xf32>
    %56 = math.rsqrt %55 : vector<2x8x1xf32>
    %57 = vector.broadcast %56 : vector<2x8x1xf32> to vector<2x8x32xf32>
    %58 = arith.mulf %48, %57 : vector<2x8x32xf32>
    %59 = vector.shape_cast %58 : vector<2x8x32xf32> to vector<16x32xf32>
    %c0_29 = arith.constant 0 : index
    %c0_30 = arith.constant 0 : index
    %60 = vector.load %arg7[%c0_29, %c0_30] : memref<32x64xf32, #tpu.memory_space<vmem>>, vector<32x64xf32>
    %cst_31 = arith.constant dense<0.000000e+00> : vector<16x64xf32>
    %61 = tpu.matmul %59, %60, %cst_31 {dimension_numbers = #tpu.dot_dimension_numbers<[1], [0], [0], [1], [0, 0, 1, 1], [], []>} : vector<16x32xf32>, vector<32x64xf32>, vector<16x64xf32> -> vector<16x64xf32>
    %cst_32 = arith.constant 0.000000e+00 : f32
    %62 = vector.broadcast %cst_32 : f32 to vector<16x64xf32>
    %63 = arith.maximumf %61, %62 : vector<16x64xf32>
    %c0_33 = arith.constant 0 : index
    %c0_34 = arith.constant 0 : index
    %64 = vector.load %arg8[%c0_33, %c0_34] : memref<64x32xf32, #tpu.memory_space<vmem>>, vector<64x32xf32>
    %cst_35 = arith.constant dense<0.000000e+00> : vector<16x32xf32>
    %65 = tpu.matmul %63, %64, %cst_35 {dimension_numbers = #tpu.dot_dimension_numbers<[1], [0], [0], [1], [0, 0, 1, 1], [], []>} : vector<16x64xf32>, vector<64x32xf32>, vector<16x32xf32> -> vector<16x32xf32>
    %66 = vector.shape_cast %48 : vector<2x8x32xf32> to vector<16x32xf32>
    %67 = arith.addf %66, %65 : vector<16x32xf32>
    %c0_36 = arith.constant 0 : index
    %c0_37 = arith.constant 0 : index
    %68 = vector.load %arg9[%c0_36, %c0_37] : memref<32x32xf32, #tpu.memory_space<vmem>>, vector<32x32xf32>
    %cst_38 = arith.constant dense<0.000000e+00> : vector<16x32xf32>
    %69 = tpu.matmul %67, %68, %cst_38 {dimension_numbers = #tpu.dot_dimension_numbers<[1], [0], [0], [1], [0, 0, 1, 1], [], []>} : vector<16x32xf32>, vector<32x32xf32>, vector<16x32xf32> -> vector<16x32xf32>
    %70 = vector.shape_cast %69 : vector<16x32xf32> to vector<2x8x32xf32>
    %c0_39 = arith.constant 0 : index
    %c0_40 = arith.constant 0 : index
    %c0_41 = arith.constant 0 : index
    %71 = vector.load %arg11[%c0_39, %c0_40, %c0_41] : memref<2x8x32xf32, #tpu.memory_space<vmem>>, vector<2x8x32xf32>
    tpu.vector_store %arg11[%c0_39, %c0_40, %c0_41], %70 {strides = array<i32>} : memref<2x8x32xf32, #tpu.memory_space<vmem>>, vector<2x8x32xf32>,
    %c0_42 = arith.constant 0 : index
    %c0_43 = arith.constant 0 : index
    %72 = vector.load %arg10[%c0_42, %c0_43] : memref<32x32xf32, #tpu.memory_space<vmem>>, vector<32x32xf32>
    %cst_44 = arith.constant dense<0.000000e+00> : vector<16x32xf32>
    %73 = tpu.matmul %67, %72, %cst_44 {dimension_numbers = #tpu.dot_dimension_numbers<[1], [0], [0], [1], [0, 0, 1, 1], [], []>} : vector<16x32xf32>, vector<32x32xf32>, vector<16x32xf32> -> vector<16x32xf32>
    %74 = vector.shape_cast %73 : vector<16x32xf32> to vector<2x8x32xf32>
    %c0_45 = arith.constant 0 : index
    %c0_46 = arith.constant 0 : index
    %c0_47 = arith.constant 0 : index
    %75 = vector.load %arg12[%c0_45, %c0_46, %c0_47] : memref<2x8x32xf32, #tpu.memory_space<vmem>>, vector<2x8x32xf32>
    tpu.vector_store %arg12[%c0_45, %c0_46, %c0_47], %74 {strides = array<i32>} : memref<2x8x32xf32, #tpu.memory_space<vmem>>, vector<2x8x32xf32>,
    return
  }
  func.func @transform_0(%arg0: i32) -> (i32, i32, i32) {
    %c0_i32 = arith.constant 0 : i32
    %c0_i32_0 = arith.constant 0 : i32
    %c0_i32_1 = arith.constant 0 : i32
    %c0_i32_2 = arith.constant 0 : i32
    return %c0_i32, %c0_i32_0, %c0_i32_1 : i32, i32, i32
  }
  func.func @transform_1(%arg0: i32) -> (i32, i32) {
    %c0_i32 = arith.constant 0 : i32
    %c0_i32_0 = arith.constant 0 : i32
    %c0_i32_1 = arith.constant 0 : i32
    return %c0_i32, %c0_i32_0 : i32, i32
  }
  func.func @transform_2(%arg0: i32) -> (i32, i32) {
    %c0_i32 = arith.constant 0 : i32
    %c0_i32_0 = arith.constant 0 : i32
    %c0_i32_1 = arith.constant 0 : i32
    return %c0_i32, %c0_i32_0 : i32, i32
  }
  func.func @transform_3(%arg0: i32) -> (i32, i32) {
    %c0_i32 = arith.constant 0 : i32
    %c0_i32_0 = arith.constant 0 : i32
    %c0_i32_1 = arith.constant 0 : i32
    return %c0_i32, %c0_i32_0 : i32, i32
  }
  func.func @transform_4(%arg0: i32) -> (i32, i32) {
    %c0_i32 = arith.constant 0 : i32
    %c0_i32_0 = arith.constant 0 : i32
    %c0_i32_1 = arith.constant 0 : i32
    return %c0_i32, %c0_i32_0 : i32, i32
  }
  func.func @transform_5(%arg0: i32) -> (i32, i32) {
    %c0_i32 = arith.constant 0 : i32
    %c0_i32_0 = arith.constant 0 : i32
    %c0_i32_1 = arith.constant 0 : i32
    return %c0_i32, %c0_i32_0 : i32, i32
  }
  func.func @transform_6(%arg0: i32) -> (i32, i32) {
    %c0_i32 = arith.constant 0 : i32
    %c0_i32_0 = arith.constant 0 : i32
    %c0_i32_1 = arith.constant 0 : i32
    return %c0_i32, %c0_i32_0 : i32, i32
  }
  func.func @transform_7(%arg0: i32) -> (i32, i32) {
    %c0_i32 = arith.constant 0 : i32
    %c0_i32_0 = arith.constant 0 : i32
    %c0_i32_1 = arith.constant 0 : i32
    return %c0_i32, %c0_i32_0 : i32, i32
  }
  func.func @transform_8(%arg0: i32) -> (i32, i32) {
    %c0_i32 = arith.constant 0 : i32
    %c0_i32_0 = arith.constant 0 : i32
    %c0_i32_1 = arith.constant 0 : i32
    return %c0_i32, %c0_i32_0 : i32, i32
  }
  func.func @transform_9(%arg0: i32) -> (i32, i32) {
    %c0_i32 = arith.constant 0 : i32
    %c0_i32_0 = arith.constant 0 : i32
    %c0_i32_1 = arith.constant 0 : i32
    return %c0_i32, %c0_i32_0 : i32, i32
  }
  func.func @transform_10(%arg0: i32) -> (i32, i32, i32) {
    %c0_i32 = arith.constant 0 : i32
    %c0_i32_0 = arith.constant 0 : i32
    %c0_i32_1 = arith.constant 0 : i32
    %c0_i32_2 = arith.constant 0 : i32
    return %c0_i32, %c0_i32_0, %c0_i32_1 : i32, i32, i32
  }
  func.func @transform_11(%arg0: i32) -> (i32, i32, i32) {
    %c0_i32 = arith.constant 0 : i32
    %c0_i32_0 = arith.constant 0 : i32
    %c0_i32_1 = arith.constant 0 : i32
    %c0_i32_2 = arith.constant 0 : i32
    return %c0_i32, %c0_i32_0, %c0_i32_1 : i32, i32, i32
  }
}

</mosaic_0001>

<bundles_post_ra>
// kernel: chronos_forward.1
= control target key start
LH: loop header
LB: loop body
LE: loop exit
PB: predicated region body
PF: predicated region fallthrough
CT: control target
= control target key end

     0   :  { %vm44_vm0 = vcmask 261120   ;;  %v1409_v34 = vmov 0.0   ;;  %vm1410_vm1 = vmmov 0   ;;  %v1411_v41 = vmov 1966171168   ;;  %s1661_s0 = inlined_call_operand.vmem [shape: f32[2,8,32], index: 0, kind: input, shape index: {}]   ;;  %s1662_s2 = inlined_call_operand.vmem [shape: f32[32,32], index: 2, kind: input, shape index: {}]   ;;  %s1663_s3 = inlined_call_operand.vmem [shape: f32[32,32], index: 3, kind: input, shape index: {}]   ;;  %s1664_s4 = inlined_call_operand.vmem [shape: f32[32,32], index: 4, kind: input, shape index: {}]   ;;  %s1665_s1 = inlined_call_operand.vmem [shape: f32[2,8], index: 1, kind: input, shape index: {}]   ;;  %s1666_s5 = inlined_call_operand.vmem [shape: f32[32,32], index: 5, kind: input, shape index: {}]   ;;  %s1667_s6 = inlined_call_operand.vmem [shape: f32[32,64], index: 6, kind: input, shape index: {}]   ;;  %s1668_s7 = inlined_call_operand.vmem [shape: f32[64,32], index: 7, kind: input, shape index: {}]   ;;  %s1669_s8 = inlined_call_operand.vmem [shape: f32[32,32], index: 8, kind: input, shape index: {}]   ;;  %s1670_s9 = inlined_call_operand.vmem [shape: f32[32,32], index: 9, kind: input, shape index: {}]   ;;  %s1671_s10 = inlined_call_operand.vmem [shape: f32[2,8,32], index: 10, kind: output, shape index: {0}]   ;;  %s1672_s11 = inlined_call_operand.vmem [shape: f32[2,8,32], index: 11, kind: output, shape index: {1}]  }
   0x1   :  { %v1475_v0 = vld [vmem:[%s1661_s0] sm:$0xff]  ;;  %v1480_v1 = vld [vmem:[%s1661_s0 + $0x8] sm:$0xff]  ;;  %v62_v11 = vld [vmem:[%s1662_s2 + $0x10] sm:$0xff]  ;;  %v459_v42 = vunpack.c.l.s4 %v1411_v41  ;;  %v461_v43 = vlaneseq  ;;  %vm492_vm2 = vcmask 64512   ;;  %vm859_vm3 = vcmask 523264  }
   0x2   :  { %v42_v2 = vmul.f32 %v1475_v0, %v1475_v0  ;;  %v43_v3 = vmul.f32 %v1480_v1, %v1480_v1  ;;  %v60_v6 = vld [vmem:[%s1662_s2] sm:$0xff]  ;;  %v61_v7 = vld [vmem:[%s1662_s2 + $0x8] sm:$0xff]  ;;  %v63_v12 = vld [vmem:[%s1662_s2 + $0x18] sm:$0xff] }
   0x3   :  { %v145_v8 = vld [vmem:[%s1663_s3] sm:$0xff]  ;;  %v1318_v9 = vpack.c.bf16 %v61_v7, %v60_v6  ;;  %v146_v10 = vld [vmem:[%s1663_s3 + $0x8] sm:$0xff]  ;;  %v1322_v14 = vpack.c.bf16 %v63_v12, %v62_v11  ;;  %v147_v15 = vld [vmem:[%s1663_s3 + $0x10] sm:$0xff]  ;;  %v460_v46 = vunpack.c.0.s8 %v459_v42  ;;  %v462_v47 = vshrl.u32 %v461_v43, 7 }
   0x4   :  { %v45_v4 = vsel %vm44_vm0, %v42_v2, 0.0  ;;  %v48_v5 = vsel %vm44_vm0, %v43_v3, 0.0  ;;  %v1326_v13 = vpack.c.bf16 %v146_v10, %v145_v8  ;;  %v148_v16 = vld [vmem:[%s1663_s3 + $0x18] sm:$0xff]  ;;  %v224_v18 = vld [vmem:[%s1664_s4] sm:$0xff]  ;;  %v225_v19 = vld [vmem:[%s1664_s4 + $0x8] sm:$0xff] }
   0x5   :  { %46 = vadd.xlane.f32.xlu0 %v45_v4  ;;  %1319 = vmatprep.subr.bf16.mxu0 %v1318_v9  ;;  %v1330_v17 = vpack.c.bf16 %v148_v16, %v147_v15  ;;  %v1334_v20 = vpack.c.bf16 %v225_v19, %v224_v18  ;;  %v226_v29 = vld [vmem:[%s1664_s4 + $0x10] sm:$0xff]  ;;  %v227_v30 = vld [vmem:[%s1664_s4 + $0x18] sm:$0xff]  ;;  %v39_v44 = vld [vmem:[%s1665_s1] sm:$0x3]  ;;  %v463_v49 = vsub.s32 %v460_v46, %v462_v47  ;;  %v482_v52 = vsub.s32 0, %v462_v47 }
   0x6   :  { %1321 = vmatpush3.bf16.msra.mxu0 %v1318_v9  ;;  %1327 = vmatprep.subr.bf16.mxu1 %v1326_v13  ;;  %v1338_v33 = vpack.c.bf16 %v227_v30, %v226_v29  ;;  %v1119_v45 = vadd.f32 -1.0, %v39_v44  ;;  %v661_v15 = vld [vmem:[%s1666_s5] sm:$0xff]  ;;  %v662_v16 = vld [vmem:[%s1666_s5 + $0x8] sm:$0xff]  ;;  %v767_v41 = vld [vmem:[%s1667_s6 + $0x18] sm:$0xff] }
   0x7   :  { %1329 = vmatpush3.bf16.msra.mxu1 %v1326_v13  ;;  %1323 = vmatprep.subr.bf16.mxu0 %v1322_v14  ;;  %v851_v43 = vld [vmem:[%s1668_s7] sm:$0xff]  ;;  %v852_v44 = vld [vmem:[%s1668_s7 + $0x8] sm:$0xff]  ;;  %v854_v47 = vld [vmem:[%s1668_s7 + $0x18] sm:$0xff] }
   0x8   :  { %1331 = vmatprep.subr.bf16.mxu1 %v1330_v17  ;;  %v41_v48 = vmul.f32 1e+09, %v1119_v45  ;;  %v853_v45 = vld [vmem:[%s1668_s7 + $0x10] sm:$0xff]  ;;  %v1358_v46 = vpack.c.bf16 %v852_v44, %v851_v43 }
   0x9   :  { %49 = vadd.xlane.f32.xlu0 %v48_v5 }
   0xa   :  { %1325 = vmatpush3.bf16.msra.mxu0 %v1322_v14  ;;  %v464_v50 = vrot.slane %v41_v48, %v463_v49  ;;  %v1362_v48 = vpack.c.bf16 %v854_v47, %v853_v45 }
   0xb   :  { %1333 = vmatpush3.bf16.msra.mxu1 %v1330_v17  ;;  %1335 = vmatprep.subr.bf16.mxu0 %v1334_v20  ;;  %v1342_v17 = vpack.c.bf16 %v662_v16, %v661_v15 }
   0xc   :  { %1235 = vmatprep.subr.mxu1 %v1409_v34  ;;  %v472_v51 = vrot.slane %v464_v50, %v463_v49  ;;  %v465_v53 = vcombine.high %v464_v50, %v464_v50  ;;  %v856_v50 = vld [vmem:[%s1668_s7 + $0x28] sm:$0xff] }
   0xe   :  { %v483_v54 = vrot.slane %v472_v51, %v482_v52  ;;  %v479_v55 = vrot.slane %v465_v53, %v463_v49  ;;  %v855_v49 = vld [vmem:[%s1668_s7 + $0x20] sm:$0xff] }
   0xf   :  { %v1366_v51 = vpack.c.bf16 %v856_v50, %v855_v49 }
  0x10   :  { %v487_v60 = vrot.slane %v479_v55, %v482_v52 }
  0x92   :  { %v47_v21 = vpop.xlane.xlu0 %46 }
  0x93   :  { %v52_v22 = vmul.f32 0.03125, %v47_v21 }
  0x95   :  { %v54_v23 = vadd.f32 1e-06, %v52_v22 }
  0x96   :  { %v50_v24 = vpop.xlane.xlu0 %49 }
  0x97   :  { %1393 = vrsqrt.f32 %v54_v23  ;;  %v53_v25 = vmul.f32 0.03125, %v50_v24  ;;  %v663_v24 = vld [vmem:[%s1666_s5 + $0x10] sm:$0xff] }
  0x99   :  { %v55_v26 = vadd.f32 1e-06, %v53_v25  ;;  %v664_v25 = vld [vmem:[%s1666_s5 + $0x18] sm:$0xff] }
  0x9b   :  { %1395 = vrsqrt.f32 %v55_v26  ;;  %v1346_v26 = vpack.c.bf16 %v664_v25, %v663_v24 }
  0xa1   :  { %v1394_v27 = vpop.eup %1393 }
  0xa2   :  { %v58_v28 = vmul.f32 %v1394_v27, %v1475_v0 }
  0xa4   :  { %1210 = vmatprep.mubr.msk.f32.mxu0 %vm44_vm0, %v58_v28  ;;  %1221 = vmatprep.mubr.msk.f32.mxu1 %vm44_vm0, %v58_v28 }
  0xa5   :  { %v1396_v31 = vpop.eup %1395 }
  0xa6   :  { %v59_v32 = vmul.f32 %v1396_v31, %v1480_v1 }
  0xa8   :  { %1211 = vmatmul.mubr.msk.f32.vlgmr.msra.gmra.mrb[0].mxu0 %vm44_vm0, %v59_v32  ;;  %1222 = vmatmul.mubr.msk.f32.vlgmr.msra.gmra.mrb[0].mxu1 %vm44_vm0, %v59_v32 }
  0xa9   :  { %1337 = vmatpush3.bf16.msra.mxu0 %v1334_v20  ;;  %1232 = vmatprep.mubr.msk.f32.mxu0 %vm44_vm0, %v58_v28 }
  0xaa   :  { %1339 = vmatprep.subr.bf16.mxu0 %v1338_v33  ;;  %1237 = vmatprep.mubr.msk.f32.mxu1 %vm1410_vm1, %v1409_v34 }
  0xad   :  { %1341 = vmatpush3.bf16.msra.mxu0 %v1338_v33 }
  0xae   :  { %1245 = vmatprep.subr.mxu0 %v1409_v34 }
  0xb0   :  { %1233 = vmatmul.mubr.msk.f32.vlgmr.msra.gmra.mrb[2].mxu0 %vm44_vm0, %v59_v32 }
  0xb1   :  { %1247 = vmatprep.mubr.msk.f32.mxu0 %vm1410_vm1, %v1409_v34 }
 0x17b   :  { %v1212_v35 = vpop.f32.mrb[0].mxu0  ;;  %v1223_v36 = vpop.f32.mrb[0].mxu1 }
 0x17c   :  { %v136_v37 = vpop.f32.mrb[1].mxu0  ;;  %v215_v38 = vpop.f32.mrb[1].mxu1 }
 0x17d   :  { %1236 = vmatpush3.xpose.msk.msra.mxu1 %vm44_vm0, %v215_v38 }
 0x17e   :  { %1240 = vmatprep.subr.mxu1 %v1409_v34 }
 0x180   :  { %1238 = vmatmul.mubr.msk.f32.vlgmr.msra.gmra.mrb[2].mxu1 %vm44_vm0, %v136_v37 }
 0x181   :  { %1241 = vmatpush3.xpose.msk.msra.mxu1 %vm44_vm0, %v1223_v36  ;;  %1242 = vmatprep.mubr.msk.f32.mxu1 %vm1410_vm1, %v1409_v34 }
 0x182   :  { %1250 = vmatprep.subr.mxu1 %v1409_v34 }
 0x183   :  { %v1234_v39 = vpop.f32.mrb[2].mxu0 }
 0x184   :  { %v294_v40 = vpop.f32.mrb[3].mxu0  ;;  %1243 = vmatmul.mubr.msk.f32.vlgmr.msra.gmra.mrb[4].mxu1 %vm44_vm0, %v1212_v35 }
 0x185   :  { %1246 = vmatpush3.msra.mxu0 %v294_v40  ;;  %1251 = vmatpush3.msra.mxu1 %v1234_v39  ;;  %v766_v40 = vld [vmem:[%s1667_s6 + $0x10] sm:$0xff] }
 0x186   :  { %1252 = vmatprep.mubr.msk.f32.mxu1 %vm1410_vm1, %v1409_v34  ;;  %1343 = vmatprep.subr.bf16.mxu0 %v1342_v17  ;;  %v1354_v42 = vpack.c.bf16 %v767_v41, %v766_v40 }
 0x253   :  { %v375_v56 = vpop.f32.mrb[2].mxu1 }
 0x254   :  { %v455_v57 = vmul.f32 0.17677669, %v375_v56  ;;  %v1239_v58 = vpop.f32.mrb[3].mxu1 }
 0x256   :  { %v490_v59 = vadd.f32 %v483_v54, %v455_v57 }
 0x257   :  { %v451_v61 = vpop.f32.mrb[4].mxu1 }
 0x258   :  { %v456_v62 = vmul.f32 0.17677669, %v451_v61  ;;  %v1244_v63 = vpop.f32.mrb[5].mxu1  ;;  %v493_v2 = vsel %vm492_vm2, %v490_v59, -inf }
 0x259   :  { %494 = vmax.xlane.f32.xlu1 %v493_v2  ;;  %v858_v63 = vld [vmem:[%s1668_s7 + $0x38] sm:$0xff] }
 0x25a   :  { %v491_v3 = vadd.f32 %v487_v60, %v456_v62  ;;  %v857_v62 = vld [vmem:[%s1668_s7 + $0x30] sm:$0xff] }
 0x25b   :  { %v1370_v2 = vpack.c.bf16 %v858_v63, %v857_v62 }
 0x25c   :  { %v496_v4 = vsel %vm492_vm2, %v491_v3, -inf }
 0x25d   :  { %497 = vmax.xlane.f32.xlu1 %v496_v4  ;;  %v944_v4 = vld [vmem:[%s1669_s8 + $0x8] sm:$0xff] }
 0x2e6   :  { %v495_v5 = vpop.xlane.xlu1 %494 }
 0x2e7   :  { %v499_v6 = vsub.f32 %v490_v59, %v495_v5 }
 0x2e9   :  { %v501_v7 = vmul.f32 1.442695, %v499_v6 }
 0x2ea   :  { %v498_v8 = vpop.xlane.xlu1 %497 }
 0x2eb   :  { %1397 = vpow2.f32 %v501_v7  ;;  %v500_v9 = vsub.f32 %v491_v3, %v498_v8  ;;  %v943_v3 = vld [vmem:[%s1669_s8] sm:$0xff] }
 0x2ec   :  { %v1374_v5 = vpack.c.bf16 %v944_v4, %v943_v3 }
 0x2ed   :  { %v503_v10 = vmul.f32 1.442695, %v500_v9 }
 0x2ef   :  { %1399 = vpow2.f32 %v503_v10  ;;  %v945_v10 = vld [vmem:[%s1669_s8 + $0x10] sm:$0xff] }
 0x2f5   :  { %v1398_v11 = vpop.eup %1397 }
 0x2f6   :  { %v505_v12 = vsel %vm492_vm2, %v1398_v11, 0.0 }
 0x2f7   :  { %506 = vadd.xlane.f32.xlu0 %v505_v12 }
 0x2f9   :  { %v1400_v13 = vpop.eup %1399 }
 0x2fa   :  { %v508_v14 = vsel %vm492_vm2, %v1400_v13, 0.0 }
 0x2fb   :  { %509 = vadd.xlane.f32.xlu1 %v508_v14  ;;  %v1031_v14 = vld [vmem:[%s1670_s9 + $0x8] sm:$0xff] }
 0x384   :  { %v507_v18 = vpop.xlane.xlu0 %506 }
 0x385   :  { %1401 = vrcp.f32 %v507_v18  ;;  %v1033_v18 = vld [vmem:[%s1670_s9 + $0x18] sm:$0xff] }
 0x388   :  { %v510_v19 = vpop.xlane.xlu1 %509 }
 0x389   :  { %1403 = vrcp.f32 %v510_v19 }
 0x38f   :  { %v1402_v20 = vpop.eup %1401 }
 0x390   :  { %v512_v21 = vmul.f32 %v1402_v20, %v1398_v11  ;;  %v946_v11 = vld [vmem:[%s1669_s8 + $0x18] sm:$0xff] }
 0x391   :  { %v1378_v12 = vpack.c.bf16 %v946_v11, %v945_v10 }
 0x392   :  { %1248 = vmatmul.mubr.msk.f32.vlgmr.msra.gmra.mrb[4].mxu0 %vm492_vm2, %v512_v21 }
 0x393   :  { %v1404_v22 = vpop.eup %1403  ;;  %1345 = vmatpush3.bf16.msra.mxu0 %v1342_v17  ;;  %v1032_v17 = vld [vmem:[%s1670_s9 + $0x10] sm:$0xff] }
 0x394   :  { %v514_v23 = vmul.f32 %v1404_v22, %v1400_v13  ;;  %1347 = vmatprep.subr.bf16.mxu0 %v1346_v26  ;;  %v1030_v13 = vld [vmem:[%s1670_s9] sm:$0xff]  ;;  %v1386_v22 = vpack.c.bf16 %v1033_v18, %v1032_v17 }
 0x395   :  { %v1382_v15 = vpack.c.bf16 %v1031_v14, %v1030_v13 }
 0x396   :  { %1253 = vmatmul.mubr.msk.f32.vlgmr.msra.gmra.mrb[6].mxu1 %vm492_vm2, %v514_v23 }
 0x397   :  { %1349 = vmatpush3.bf16.msra.mxu0 %v1346_v26 }
 0x398   :  { %1359 = vmatprep.subr.bf16.mxu0 %v1358_v46 }
 0x465   :  { %v584_v27 = vpop.f32.mrb[4].mxu0 }
 0x466   :  { %v1249_v28 = vpop.f32.mrb[5].mxu0  ;;  %1263 = vmatprep.mubr.msk.f32.mxu0 %vm44_vm0, %v584_v27 }
 0x469   :  { %v657_v29 = vpop.f32.mrb[6].mxu1 }
 0x46a   :  { %v1254_v30 = vpop.f32.mrb[7].mxu1  ;;  %1264 = vmatmul.mubr.msk.f32.vlgmr.msra.gmra.mrb[6].mxu0 %vm44_vm0, %v657_v29 }
 0x46b   :  { %1361 = vmatpush3.bf16.msra.mxu0 %v1358_v46 }
 0x46c   :  { %1363 = vmatprep.subr.bf16.mxu0 %v1362_v48 }
 0x46f   :  { %1365 = vmatpush3.bf16.msra.mxu0 %v1362_v48 }
 0x470   :  { %1367 = vmatprep.subr.bf16.mxu0 %v1366_v51 }
 0x473   :  { %1369 = vmatpush3.bf16.msra.mxu0 %v1366_v51 }
 0x474   :  { %1371 = vmatprep.subr.bf16.mxu0 %v1370_v2 }
 0x477   :  { %1373 = vmatpush3.bf16.msra.mxu0 %v1370_v2 }
 0x53d   :  { %v1265_v31 = vpop.f32.mrb[6].mxu0 }
 0x53e   :  { %v1564_v32 = vadd.f32 %v1265_v31, %v1480_v1  ;;  %v737_v33 = vpop.f32.mrb[7].mxu0  ;;  %v764_v1 = vld [vmem:[%s1667_s6] sm:$0xff] }
 0x53f   :  { %v1567_v34 = vadd.f32 %v737_v33, %v1475_v0  ;;  %v765_v0 = vld [vmem:[%s1667_s6 + $0x8] sm:$0xff] }
 0x540   :  { %v749_v35 = vmul.f32 %v1564_v32, %v1564_v32  ;;  %v1350_v39 = vpack.c.bf16 %v765_v0, %v764_v1 }
 0x541   :  { %v748_v36 = vmul.f32 %v1567_v34, %v1567_v34 }
 0x542   :  { %v753_v37 = vsel %vm44_vm0, %v749_v35, 0.0  ;;  %1351 = vmatprep.subr.bf16.mxu1 %v1350_v39 }
 0x543   :  { %754 = vadd.xlane.f32.xlu1 %v753_v37  ;;  %v750_v38 = vsel %vm44_vm0, %v748_v36, 0.0  ;;  %1353 = vmatpush3.bf16.msra.mxu1 %v1350_v39 }
 0x544   :  { %751 = vadd.xlane.f32.xlu0 %v750_v38  ;;  %1355 = vmatprep.subr.bf16.mxu1 %v1354_v42 }
 0x547   :  { %1357 = vmatpush3.bf16.msra.mxu1 %v1354_v42 }
 0x548   :  { %1375 = vmatprep.subr.bf16.mxu1 %v1374_v5 }
 0x5d0   :  { %v755_v52 = vpop.xlane.xlu1 %754 }
 0x5d1   :  { %v757_v53 = vmul.f32 0.03125, %v755_v52  ;;  %v752_v54 = vpop.xlane.xlu0 %751 }
 0x5d2   :  { %v756_v55 = vmul.f32 0.03125, %v752_v54 }
 0x5d3   :  { %v759_v56 = vadd.f32 1e-06, %v757_v53 }
 0x5d4   :  { %v758_v57 = vadd.f32 1e-06, %v756_v55 }
 0x5d5   :  { %1405 = vrsqrt.f32 %v759_v56 }
 0x5d6   :  { %1407 = vrsqrt.f32 %v758_v57 }
 0x5df   :  { %v1406_v58 = vpop.eup %1405 }
 0x5e0   :  { %v1408_v59 = vpop.eup %1407  ;;  %v763_v61 = vmul.f32 %v1406_v58, %v1564_v32 }
 0x5e1   :  { %v762_v60 = vmul.f32 %v1408_v59, %v1567_v34 }
 0x5e3   :  { %1274 = vmatprep.mubr.msk.f32.mxu1 %vm44_vm0, %v762_v60 }
 0x5e4   :  { %1275 = vmatmul.mubr.msk.f32.vlgmr.msra.gmra.mrb[8].mxu1 %vm44_vm0, %v763_v61 }
 0x5e5   :  { %1377 = vmatpush3.bf16.msra.mxu1 %v1374_v5 }
 0x5e6   :  { %1379 = vmatprep.subr.bf16.mxu1 %v1378_v12 }
 0x5e9   :  { %1381 = vmatpush3.bf16.msra.mxu1 %v1378_v12 }
 0x5ea   :  { %1383 = vmatprep.subr.bf16.mxu1 %v1382_v15 }
 0x6b7   :  { %v1276_v6 = vpop.f32.mrb[8].mxu1 }
 0x6b8   :  { %v840_v7 = vpop.f32.mrb[9].mxu1  ;;  %v850_v9 = vmax.f32 %v1276_v6, 0.0 }
 0x6b9   :  { %v849_v8 = vmax.f32 %v840_v7, 0.0 }
 0x6bb   :  { %1293 = vmatprep.mubr.msk.f32.mxu0 %vm859_vm3, %v849_v8 }
 0x6bc   :  { %1294 = vmatmul.mubr.msk.f32.vlgmr.msra.gmra.mrb[8].mxu0 %vm859_vm3, %v850_v9 }
 0x78f   :  { %v1295_v16 = vpop.f32.mrb[8].mxu0 }
 0x790   :  { %v932_v19 = vpop.f32.mrb[9].mxu0  ;;  %v942_v21 = vadd.f32 %v1295_v16, %v1564_v32 }
 0x791   :  { %v941_v20 = vadd.f32 %v932_v19, %v1567_v34 }
 0x793   :  { %1304 = vmatprep.mubr.msk.f32.mxu1 %vm44_vm0, %v941_v20 }
 0x794   :  { %1305 = vmatmul.mubr.msk.f32.vlgmr.msra.gmra.mrb[10].mxu1 %vm44_vm0, %v942_v21 }
 0x795   :  { %1385 = vmatpush3.bf16.msra.mxu1 %v1382_v15  ;;  %1315 = vmatprep.mubr.msk.f32.mxu1 %vm44_vm0, %v941_v20 }
 0x796   :  { %1387 = vmatprep.subr.bf16.mxu1 %v1386_v22 }
 0x799   :  { %1389 = vmatpush3.bf16.msra.mxu1 %v1386_v22 }
 0x79c   :  { %1316 = vmatmul.mubr.msk.f32.vlgmr.msra.gmra.mrb[12].mxu1 %vm44_vm0, %v942_v21 }
 0x867   :  { %v1306_v23 = vpop.f32.mrb[10].mxu1 }
 0x868   :  { %1029 = vst.msk [vmem:[%s1671_s10 + $0x8] sm:$0xff] %vm44_vm0, %v1306_v23  ;;  %v1019_v24 = vpop.f32.mrb[11].mxu1 }
 0x869   :  { %1028 = vst.msk [vmem:[%s1671_s10] sm:$0xff] %vm44_vm0, %v1019_v24 }
 0x86f   :  { %v1317_v25 = vpop.f32.mrb[12].mxu1 }
 0x870   :  { %1110 = vst.msk [vmem:[%s1672_s11 + $0x8] sm:$0xff] %vm44_vm0, %v1317_v25  ;;  %v1100_v26 = vpop.f32.mrb[13].mxu1 }
 0x871   :  { %1109 = vst.msk [vmem:[%s1672_s11] sm:$0xff] %vm44_vm0, %v1100_v26 }

// kernel: closed_call.18
= control target key start
LH: loop header
LB: loop body
LE: loop exit
PB: predicated region body
PF: predicated region fallthrough
CT: control target
= control target key end

     0   :  { %s3070_s15 = smov 0   ;;  %s3422_s0 = inlined_call_operand.<no memory space> [shape: s32[1], index: 0, kind: input, shape index: {}]   ;;  %s3423_s1 = inlined_call_operand.vmem [shape: f32[4,5,32], index: 1, kind: input, shape index: {}]   ;;  %s3424_s2 = inlined_call_operand.vmem [shape: f32[4,8,32], index: 2, kind: input, shape index: {}]   ;;  %s3425_s3 = inlined_call_operand.vmem [shape: f32[4,8,32], index: 3, kind: input, shape index: {}]   ;;  %s3426_s4 = inlined_call_operand.vmem [shape: f32[4,1,8], index: 4, kind: input, shape index: {}]   ;;  %s3427_s5 = inlined_call_operand.vmem [shape: f32[32,32], index: 5, kind: input, shape index: {}]   ;;  %s3428_s6 = inlined_call_operand.vmem [shape: f32[32,32], index: 6, kind: input, shape index: {}]   ;;  %s3429_s7 = inlined_call_operand.vmem [shape: f32[32,32], index: 7, kind: input, shape index: {}]   ;;  %s3430_s8 = inlined_call_operand.vmem [shape: f32[32,32], index: 8, kind: input, shape index: {}]   ;;  %s3431_s9 = inlined_call_operand.vmem [shape: f32[32,32], index: 9, kind: input, shape index: {}]   ;;  %s3432_s10 = inlined_call_operand.vmem [shape: f32[32,32], index: 10, kind: input, shape index: {}]   ;;  %s3433_s11 = inlined_call_operand.vmem [shape: f32[32,64], index: 11, kind: input, shape index: {}]   ;;  %s3434_s12 = inlined_call_operand.vmem [shape: f32[64,32], index: 12, kind: input, shape index: {}]   ;;  %s3435_s13 = inlined_call_operand.vmem [shape: f32[32,128], index: 13, kind: input, shape index: {}]   ;;  %s3436_s14 = inlined_call_operand.vmem [shape: f32[4,1,128], index: 14, kind: output, shape index: {}]  }
   0x1   :  { %19 = sst [smem:[#allocation3]] %s3422_s0 }
   0x2 LB: > { %s2617_s16 = sadd.s32 4294967295, %s2986_s15   ;;  %p2621_p0 = scmp.ge.s32.totalorder %s2986_s15, 1  ;;  %s2986_s15 = sphi %s3070_s15, %s25_s15  }
   0x3   : > { %p422_p1 = scmp.lt.s32.totalorder %s2986_s15, 3 }
   0x5   : > { %p423_p2 = pnand %p2621_p0, %p422_p1 }
   0x6   : > { %s2622_s17 = sshll.u32 (!%p423_p2), %s2617_s16, 1  ;;  %s3078_s18 = sld [smem:[#allocation3]] (!%p423_p2)  ;;  %vm512_vm0 = vcmask (!%p423_p2), 258048   ;;  %vm989_vm1 = vcmask (!%p423_p2), 1041409   ;;  %vm992_vm2 = vcmask (!%p423_p2), 254976   ;;  %v608_v13 = vld [vmem:[%s3428_s6] sm:$0xff] (!%p423_p2)  ;;  %v534_v34 = vlaneseq (!%p423_p2) }
   0x7   : > { %426 = sbr.rel (%p423_p2) target bundleno = 3733 (0xe95), region = 72  ;;  %p480_p3 = scmp.lt.s32.totalorder (!%p423_p2), %s2622_s17, 3  ;;  %v609_v14 = vld [vmem:[%s3428_s6 + $0x8] sm:$0xff] (!%p423_p2)  ;;  %v829_v15 = vld [vmem:[%s3429_s7] sm:$0xff] (!%p423_p2)  ;;  %v610_v18 = vld [vmem:[%s3428_s6 + $0x10] sm:$0xff] (!%p423_p2)  ;;  %v2988_v25 = vmov (!%p423_p2), 0.0|0.0  }
   0x8   : > { %v2876_v16 = vpack.c.bf16 (!%p423_p2), %v609_v14, %v608_v13  ;;  %v830_v17 = vld [vmem:[%s3429_s7 + $0x8] sm:$0xff] (!%p423_p2)  ;;  %v611_v19 = vld [vmem:[%s3428_s6 + $0x18] sm:$0xff] (!%p423_p2)  ;;  %v831_v22 = vld [vmem:[%s3429_s7 + $0x10] sm:$0xff] (!%p423_p2)  ;;  %v2989_v26 = vmov (!%p423_p2), 0.0   ;;  %v2990_v32 = vmov (!%p423_p2), 1966171168  }
   0x9   : > { %v2884_v20 = vpack.c.bf16 (!%p423_p2), %v830_v17, %v829_v15  ;;  %v2880_v21 = vpack.c.bf16 (!%p423_p2), %v611_v19, %v610_v18  ;;  %v832_v23 = vld [vmem:[%s3429_s7 + $0x18] sm:$0xff] (!%p423_p2)  ;;  %v532_v33 = vunpack.c.l.s4 (!%p423_p2), %v2990_v32  ;;  %v535_v38 = vshrl.u32 (!%p423_p2), %v534_v34, 7  ;;  %v1005_v14 = vld [vmem:[%s3427_s5] sm:$0xff] (!%p423_p2)  ;;  %v1006_v15 = vld [vmem:[%s3427_s5 + $0x8] sm:$0xff] (!%p423_p2) }
   0xa   : > { %2877 = vmatprep.subr.bf16.mxu0 (!%p423_p2), %v2876_v16  ;;  %v2888_v24 = vpack.c.bf16 (!%p423_p2), %v832_v23, %v831_v22  ;;  %vm676_vm3 = vcmask (!%p423_p2), 261120   ;;  %v2893_v19 = vpack.c.bf16 (!%p423_p2), %v1006_v15, %v1005_v14  ;;  %v1007_v22 = vld [vmem:[%s3427_s5 + $0x10] sm:$0xff] (!%p423_p2)  ;;  %v1008_v23 = vld [vmem:[%s3427_s5 + $0x18] sm:$0xff] (!%p423_p2)  ;;  %vm2991_vm4 = vmmov (!%p423_p2), 0  }
   0xb   : > { %2885 = vmatprep.subr.bf16.mxu1 (!%p423_p2), %v2884_v20  ;;  %2879 = vmatpush3.bf16.msra.mxu0 (!%p423_p2), %v2876_v16  ;;  %v533_v37 = vunpack.c.0.s8 (!%p423_p2), %v532_v33  ;;  %vm1408_vm5 = vcmask (!%p423_p2), 1044480   ;;  %vm1342_vm7 = vcmask (!%p423_p2), 32768   ;;  %vm1404_vm8 = vcmask (!%p423_p2), 39936  }
   0xc   : > { %2887 = vmatpush3.bf16.msra.mxu1 (!%p423_p2), %v2884_v20  ;;  %2881 = vmatprep.subr.bf16.mxu0 (!%p423_p2), %v2880_v21  ;;  %vm1961_vm9 = vcmask (!%p423_p2), 57344   ;;  %vm1986_vm10 = vcmask (!%p423_p2), 64512   ;;  %vm2327_vm11 = vcmask (!%p423_p2), 523264  }
   0xd   : > { %2889 = vmatprep.subr.bf16.mxu1 (!%p423_p2), %v2888_v24  ;;  %v3131_v40 = vsub.s32 (!%p423_p2), %v533_v37, %v535_v38 }
   0xe   : > { %s3438_s17 = smov (!%p480_p3, %s2622_s17), 3 }
   0xf   : > { %s3083_s0 = sshll.u32 %s3438_s17, 3  ;;  %2883 = vmatpush3.bf16.msra.mxu0 %v2880_v21  ;;  %s500_s27 = scalar_lea.vmem %s3426_s4, %s3438_s17 }
  0x10   : > { %s483_s21 = scalar_lea.vmem %s3423_s1, %s3083_s0  ;;  %2891 = vmatpush3.bf16.msra.mxu1 %v2888_v24  ;;  %2892 = vmatprep.subr.bf16.mxu0 %v2988_v25  ;;  %v2896_v24 = vpack.c.bf16 %v1008_v23, %v1007_v22  ;;  %s489_s24 = scalar_lea.vmem %s3424_s2, %s3083_s0 }
  0x11   : > { %v508_v0 = vld [vmem:[%s483_s21] sm:$0x1f]  ;;  %s981_s22 = scalar_lea.vmem %s483_s21, %s3078_s18  ;;  %v3090_v1 = vld [vmem:[%s483_s21 + $0x8] sm:$0x1f]  ;;  %2762 = vmatprep.subr.mxu1 %v2989_v26  ;;  %s495_s30 = scalar_lea.vmem %s3425_s3, %s3083_s0 }
  0x12   : > { %v510_v2 = vmul.f32 %v508_v0, %v508_v0  ;;  %v511_v3 = vmul.f32 %v3090_v1, %v3090_v1  ;;  %v3094_v4 = vld [vmem:[%s981_s22] sm:$0x1]  ;;  %v3096_v5 = vld [vmem:[%s981_s22 + $0x8] sm:$0x1]  ;;  %s505_s28 = scalar_lea.vmem %s3436_s14, %s3438_s17 }
  0x13   : > { %v984_v6 = vmul.f32 %v3094_v4, %v3094_v4  ;;  %v985_v7 = vmul.f32 %v3096_v5, %v3096_v5 }
  0x14   : > { %v513_v8 = vsel %vm512_vm0, %v510_v2, 0.0  ;;  %v516_v10 = vsel %vm512_vm0, %v511_v3, 0.0 }
  0x15   : > { %514 = vadd.xlane.f32.xlu0 %v513_v8  ;;  %v988_v9 = vrot.slane %v985_v7, 7 }
  0x17   : > { %v990_v11 = vsel %vm989_vm1, %v988_v9, %v984_v6 }
  0x18   : > { %v993_v12 = vsel %vm992_vm2, %v990_v11, 0.0 }
  0x19   : > { %517 = vadd.xlane.f32.xlu0 %v516_v10  ;;  %994 = vadd.xlane.f32.xlu1 %v993_v12 }
  0xa2   : > { %v515_v27 = vpop.xlane.xlu0 %514 }
  0xa3   : > { %v520_v28 = vmul.f32 0.03125, %v515_v27 }
  0xa5   : > { %v522_v29 = vadd.f32 1e-06, %v520_v28 }
  0xa6   : > { %v518_v30 = vpop.xlane.xlu0 %517  ;;  %v995_v36 = vpop.xlane.xlu1 %994 }
  0xa7   : > { %2952 = vrsqrt.f32 %v522_v29  ;;  %v521_v31 = vmul.f32 0.03125, %v518_v30  ;;  %v996_v39 = vmul.f32 0.03125, %v995_v36 }
  0xa9   : > { %v523_v35 = vadd.f32 1e-06, %v521_v31  ;;  %v997_v42 = vadd.f32 1e-06, %v996_v39 }
  0xab   : > { %2954 = vrsqrt.f32 %v523_v35 }
  0xac   : > { %2956 = vrsqrt.f32 %v997_v42 }
  0xb1   : > { %v2953_v41 = vpop.eup %2952 }
  0xb2   : > { %v526_v43 = vmul.f32 %v2953_v41, %v508_v0 }
  0xb4   : > { %v530_v44 = vcombine.high %v526_v43, %v526_v43  ;;  %v537_v45 = vrot.slane %v526_v43, %v3131_v40 }
  0xb5   : > { %v2955_v46 = vpop.eup %2954 }
  0xb6   : > { %v527_v47 = vmul.f32 %v2955_v46, %v3090_v1  ;;  %v544_v48 = vrot.slane %v530_v44, %v3131_v40  ;;  %v545_v49 = vcombine.high %v537_v45, %v537_v45  ;;  %v552_v51 = vrot.slane %v537_v45, %v3131_v40  ;;  %v2957_v6 = vpop.eup %2956 }
  0xb7   : > { %v1000_v11 = vrot.slane %v2957_v6, 1  ;;  %v1003_v27 = vmul.f32 %v2957_v6, %v3094_v4 }
  0xb8   : > { %v569_v50 = vcombine.high %v527_v47, %v527_v47  ;;  %v566_v52 = vrot.slane %v545_v49, %v3131_v40  ;;  %v576_v53 = vrot.slane %v527_v47, %v3131_v40  ;;  %v559_v54 = vrot.slane %v544_v48, %v3131_v40 }
  0xb9   : > { %v1004_v20 = vmul.f32 %v1000_v11, %v3096_v5 }
  0xba   : > { %v584_v55 = vcombine.high %v576_v53, %v576_v53  ;;  %v591_v56 = vrot.slane %v576_v53, %v3131_v40  ;;  %v612_v57 = vcombine.low %v552_v51, %v566_v52  ;;  %v2630_v58 = vcombine.high %v552_v51, %v566_v52 }
  0xbb   : > { %v583_v59 = vrot.slane %v569_v50, %v3131_v40  ;;  %v1011_v28 = vrot.slane %v1004_v20, 7 }
  0xbc   : > { %v605_v60 = vrot.slane %v584_v55, %v3131_v40  ;;  %v606_v61 = vcombine.high %v591_v56, %v591_v56  ;;  %v614_v62 = vcombine.low %v559_v54, %v591_v56  ;;  %v622_v63 = vrot.slane %v612_v57, %v3131_v40 }
  0xbd   : > { %v629_v0 = vrot.slane %v2630_v58, %v3131_v40  ;;  %v598_v2 = vrot.slane %v583_v59, %v3131_v40  ;;  %v1012_v29 = vsel %vm989_vm1, %v1011_v28, %v1003_v27 }
  0xbe   : > { %v615_v1 = vcombine.low %v605_v60, %v606_v61  ;;  %v607_v3 = vcombine.high %v605_v60, %v605_v60  ;;  %v636_v7 = vrot.slane %v614_v62, %v3131_v40 }
  0xbf   : > { %v644_v9 = vcombine.low %v622_v63, %v629_v0 }
  0xc0   : > { %v643_v8 = vrot.slane %v615_v1, %v3131_v40  ;;  %v661_v10 = vcombine.low %v607_v3, %v598_v2 }
  0xc1   : > { %v652_v16 = vrot.slane %v644_v9, %v3131_v40 }
  0xc2   : > { %v645_v12 = vcombine.low %v636_v7, %v643_v8  ;;  %v668_v13 = vrot.slane %v661_v10, %v3131_v40 }
  0xc4   : > { %v659_v17 = vrot.slane %v645_v12, %v3131_v40  ;;  %v675_v21 = vrot.slane %v668_v13, %v3131_v40 }
  0xc6   : > { %v660_v18 = vcombine.low %v652_v16, %v659_v17 }
  0xc8   : > { %2737 = vmatprep.mubr.msk.f32.mxu0 %vm676_vm3, %v660_v18  ;;  %2748 = vmatprep.mubr.msk.f32.mxu1 %vm676_vm3, %v660_v18 }
  0xc9   : > { %2738 = vmatmul.mubr.msk.f32.vlgmr.msra.gmra.mrb[0].mxu0 %vm676_vm3, %v675_v21  ;;  %2749 = vmatmul.mubr.msk.f32.vlgmr.msra.gmra.mrb[0].mxu1 %vm676_vm3, %v675_v21 }
  0xca   : > { %2894 = vmatpush3.bf16.msra.mxu0 %v2893_v19  ;;  %2759 = vmatprep.mubr.msk.f32.mxu0 %vm2991_vm4, %v2989_v26 }
  0xcb   : > { %2895 = vmatprep.subr.bf16.mxu0 %v2988_v25  ;;  %2764 = vmatprep.mubr.msk.f32.mxu1 %vm2991_vm4, %v2989_v26 }
  0xce   : > { %2897 = vmatpush3.bf16.msra.mxu0 %v2896_v24 }
  0xcf   : > { %2898 = vmatprep.subr.bf16.mxu0 %v2988_v25 }
  0xd1   : > { %2760 = vmatmul.mubr.msk.f32.vlgmr.msra.gmra.mrb[2].mxu0 %vm676_vm3, %v1012_v29 }
  0xd2   : > { %2790 = vmatprep.mubr.msk.f32.mxu0 %vm2991_vm4, %v2989_v26 }
 0x19c   : > { %v2739_v30 = vpop.f32.mrb[0].mxu0  ;;  %v2750_v31 = vpop.f32.mrb[0].mxu1 }
 0x19d   : > { %v813_v32 = vrot.slane %v2739_v30, %v3131_v40  ;;  %v747_v33 = vpop.f32.mrb[1].mxu0  ;;  %v899_v35 = vpop.f32.mrb[1].mxu1  ;;  %v965_v42 = vrot.slane %v2750_v31, %v3131_v40 }
 0x19e   : > { %v758_v36 = vcombine.high %v747_v33, %v747_v33  ;;  %v765_v37 = vrot.slane %v747_v33, %v3131_v40  ;;  %v910_v38 = vcombine.high %v899_v35, %v899_v35  ;;  %v917_v39 = vrot.slane %v899_v35, %v3131_v40 }
 0x19f   : > { %v814_v41 = vcombine.high %v813_v32, %v813_v32  ;;  %v821_v46 = vrot.slane %v813_v32, %v3131_v40  ;;  %v966_v54 = vcombine.high %v965_v42, %v965_v42  ;;  %v973_v62 = vrot.slane %v965_v42, %v3131_v40 }
 0x1a0   : > { %v772_v43 = vrot.slane %v758_v36, %v3131_v40  ;;  %v773_v44 = vcombine.high %v765_v37, %v765_v37  ;;  %v924_v45 = vrot.slane %v910_v38, %v3131_v40  ;;  %v781_v47 = vrot.slane %v765_v37, %v3131_v40 }
 0x1a1   : > { %v925_v48 = vcombine.high %v917_v39, %v917_v39  ;;  %v828_v53 = vrot.slane %v814_v41, %v3131_v40  ;;  %v933_v0 = vrot.slane %v917_v39, %v3131_v40  ;;  %v980_v9 = vrot.slane %v966_v54, %v3131_v40 }
 0x1a2   : > { %v774_v49 = vcombine.high %v772_v43, %v772_v43  ;;  %v788_v50 = vrot.slane %v772_v43, %v3131_v40  ;;  %v795_v51 = vrot.slane %v773_v44, %v3131_v40  ;;  %v926_v52 = vcombine.high %v924_v45, %v924_v45 }
 0x1a3   : > { %v940_v55 = vrot.slane %v924_v45, %v3131_v40  ;;  %v947_v56 = vrot.slane %v925_v48, %v3131_v40  ;;  %v1243_v13 = vrot.slane %v828_v53, %v3131_v40  ;;  %v1503_v27 = vrot.slane %v980_v9, %v3131_v40 }
 0x1a4   : > { %v802_v57 = vrot.slane %v774_v49, %v3131_v40  ;;  %v804_v58 = vcombine.high %v788_v50, %v788_v50  ;;  %v1108_v59 = vcombine.low %v781_v47, %v795_v51  ;;  %v2636_v60 = vcombine.high %v781_v47, %v795_v51  ;;  %v1081_v61 = vpop.f32.mrb[2].mxu0 }
 0x1a5   : > { %v1130_v63 = vrot.slane %v788_v50, %v3131_v40  ;;  %v954_v1 = vrot.slane %v926_v52, %v3131_v40  ;;  %v2761_v2 = vpop.f32.mrb[3].mxu0  ;;  %v956_v10 = vcombine.high %v940_v55, %v940_v55  ;;  %v1365_v12 = vcombine.low %v933_v0, %v947_v56 }
 0x1a6   : > { %v806_v3 = vcombine.high %v802_v57, %v802_v57  ;;  %v1116_v6 = vrot.slane %v1108_v59, %v3131_v40  ;;  %v1123_v7 = vrot.slane %v2636_v60, %v3131_v40  ;;  %v1221_v8 = vcombine.low %v802_v57, %v804_v58 }
 0x1a7   : > { %v958_v11 = vcombine.high %v954_v1, %v954_v1  ;;  %v2641_v16 = vcombine.high %v933_v0, %v947_v56  ;;  %v1145_v17 = vrot.slane %v1130_v63, %v3131_v40  ;;  %v1373_v18 = vrot.slane %v1365_v12, %v3131_v40 }
 0x1a8   : > { %v1131_v14 = vcombine.low %v1116_v6, %v1123_v7  ;;  %v1222_v15 = vcombine.low %v806_v3, %v821_v46  ;;  %v1481_v19 = vcombine.low %v954_v1, %v956_v10  ;;  %v1229_v22 = vrot.slane %v1221_v8, %v3131_v40 }
 0x1a9   : > { %v1482_v20 = vcombine.low %v958_v11, %v973_v62  ;;  %v1380_v24 = vrot.slane %v2641_v16, %v3131_v40  ;;  %v1092_v30 = vrot.slane %v1081_v61, %v3131_v40  ;;  %v1258_v36 = vrot.slane %v1243_v13, %v3131_v40  ;;  %v1596_v16 = vld [vmem:[%s3430_s8 + $0x8] sm:$0xff] }
 0x1aa   : > { %v1138_v21 = vrot.slane %v1131_v14, %v3131_v40  ;;  %v1236_v23 = vrot.slane %v1222_v15, %v3131_v40  ;;  %v1489_v28 = vrot.slane %v1481_v19, %v3131_v40  ;;  %v1387_v37 = vrot.slane %v940_v55, %v3131_v40  ;;  %v1595_v15 = vld [vmem:[%s3430_s8] sm:$0xff]  ;;  %v1598_v19 = vld [vmem:[%s3430_s8 + $0x18] sm:$0xff] }
 0x1ab   : > { %v1496_v29 = vrot.slane %v1482_v20, %v3131_v40  ;;  %v1388_v33 = vcombine.low %v1373_v18, %v1380_v24  ;;  %v1518_v39 = vrot.slane %v1503_v27, %v3131_v40  ;;  %v1093_v41 = vcombine.high %v1092_v30, %v1092_v30  ;;  %v1597_v18 = vld [vmem:[%s3430_s8 + $0x10] sm:$0xff] }
 0x1ac   : > { %v1146_v31 = vcombine.low %v1138_v21, %v1145_v17  ;;  %v1244_v32 = vcombine.low %v1229_v22, %v1236_v23  ;;  %v1100_v42 = vrot.slane %v1092_v30, %v3131_v40  ;;  %v1402_v47 = vrot.slane %v1387_v37, %v3131_v40 }
 0x1ad   : > { %v1504_v35 = vcombine.low %v1489_v28, %v1496_v29  ;;  %v1395_v44 = vrot.slane %v1388_v33, %v3131_v40  ;;  %v1107_v48 = vrot.slane %v1093_v41, %v3131_v40  ;;  %v1337_v50 = vand.u32 127, %v534_v34  ;;  %v1702_v41 = vld [vmem:[%s3431_s9 + $0x10] sm:$0xff] }
 0x1ae   : > { %2763 = vmatpush3.xpose.msk.msra.mxu1 %vm676_vm3, %v1146_v31  ;;  %v1251_v38 = vrot.slane %v1244_v32, %v3131_v40  ;;  %v1338_v51 = vstv %s3078_s18  ;;  %v2899_v17 = vpack.c.bf16 %v1596_v16, %v1595_v15  ;;  %v2902_v20 = vpack.c.bf16 %v1598_v19, %v1597_v18 }
 0x1af   : > { %2767 = vmatprep.subr.mxu1 %v2989_v26  ;;  %v1511_v43 = vrot.slane %v1504_v35, %v3131_v40  ;;  %v1403_v49 = vcombine.low %v1395_v44, %v1402_v47  ;;  %vm1339_vm6 = vcmp.le.s32.totalorder %v1337_v50, %v1338_v51 }
 0x1b0   : > { %v1259_v45 = vcombine.low %v1251_v38, %v1258_v36  ;;  %2900 = vmatpush3.bf16.msra.mxu0 %v2899_v17 }
 0x1b1   : > { %2765 = vmatmul.mubr.msk.f32.vlgmr.msra.gmra.mrb[2].mxu1 %vm676_vm3, %v1100_v42  ;;  %v1519_v46 = vcombine.low %v1511_v43, %v1518_v39  ;;  %2901 = vmatprep.subr.bf16.mxu0 %v2988_v25  ;;  %v1703_v43 = vld [vmem:[%s3431_s9 + $0x18] sm:$0xff] }
 0x1b2   : > { %2768 = vmatpush3.xpose.msk.msra.mxu1 %vm676_vm3, %v1259_v45  ;;  %2769 = vmatprep.mubr.msk.f32.mxu1 %vm2991_vm4, %v2989_v26  ;;  %v2908_v44 = vpack.c.bf16 %v1703_v43, %v1702_v41 }
 0x1b3   : > { %2772 = vmatprep.subr.mxu1 %v2989_v26 }
 0x1b4   : > { %2903 = vmatpush3.bf16.msra.mxu0 %v2902_v20 }
 0x1b5   : > { %2770 = vmatmul.mubr.msk.f32.vlgmr.msra.gmra.mrb[4].mxu1 %vm676_vm3, %v1107_v48  ;;  %2804 = vmatprep.subr.mxu0 %v2989_v26 }
 0x1b6   : > { %2773 = vmatpush3.msk.msra.mxu1 %vm1408_vm5, %v1403_v49  ;;  %2774 = vmatprep.mubr.msk.f32.mxu1 %vm2991_vm4, %v2989_v26 }
 0x1b7   : > { %2777 = vmatprep.subr.mxu1 %v2989_v26 }
 0x284   : > { %v1217_v52 = vpop.f32.mrb[2].mxu1 }
 0x285   : > { %v1334_v53 = vmul.f32 0.17677669, %v1217_v52  ;;  %v2766_v54 = vpop.f32.mrb[3].mxu1 }
 0x286   : > { %v1803_v54 = vld [vmem:[%s489_s24] sm:$0xff] }
 0x287   : > { %v1340_v55 = vsel %vm1339_vm6, %v1334_v53, -1e+09 }
 0x288   : > { %v1330_v56 = vpop.f32.mrb[4].mxu1  ;;  %v1343_v57 = vsel %vm1342_vm7, %v1340_v55, -inf }
 0x289   : > { %v1335_v58 = vmul.f32 0.17677669, %v1330_v56  ;;  %1344 = vmax.xlane.f32.xlu1 %v1343_v57  ;;  %v2771_v59 = vpop.f32.mrb[5].mxu1 }
 0x28b   : > { %v1341_v60 = vsel %vm1339_vm6, %v1335_v58, -1e+09 }
 0x28c   : > { %v1346_v61 = vsel %vm1342_vm7, %v1341_v60, -inf }
 0x28d   : > { %1347 = vmax.xlane.f32.xlu0 %v1346_v61 }
 0x316   : > { %v1345_v62 = vpop.xlane.xlu1 %1344 }
 0x317   : > { %v1349_v63 = vsub.f32 %v1340_v55, %v1345_v62  ;;  %v1804_v55 = vld [vmem:[%s489_s24 + $0x8] sm:$0xff] }
 0x319   : > { %v1351_v34 = vmul.f32 1.442695, %v1349_v63  ;;  %v1957_v63 = vld [vmem:[%s500_s27] sm:$0x1] }
 0x31a   : > { %v1348_v0 = vpop.xlane.xlu0 %1347 }
 0x31b   : > { %2958 = vpow2.f32 %v1351_v34  ;;  %v1350_v1 = vsub.f32 %v1341_v60, %v1348_v0 }
 0x31d   : > { %v1353_v2 = vmul.f32 1.442695, %v1350_v1 }
 0x31f   : > { %2960 = vpow2.f32 %v1353_v2  ;;  %v1958_v2 = vld [vmem:[%s500_s27 + $0x1] sm:$0x1] }
 0x325   : > { %v2959_v3 = vpop.eup %2958 }
 0x326   : > { %v1355_v6 = vsel %vm1342_vm7, %v2959_v3, 0.0 }
 0x327   : > { %1356 = vadd.xlane.f32.xlu1 %v1355_v6 }
 0x329   : > { %v2961_v7 = vpop.eup %2960 }
 0x32a   : > { %v1358_v8 = vsel %vm1342_vm7, %v2961_v7, 0.0 }
 0x32b   : > { %1359 = vadd.xlane.f32.xlu0 %v1358_v8 }
 0x3b4   : > { %v1357_v9 = vpop.xlane.xlu1 %1356 }
 0x3b5   : > { %2962 = vrcp.f32 %v1357_v9 }
 0x3b8   : > { %v1360_v10 = vpop.xlane.xlu0 %1359 }
 0x3b9   : > { %2964 = vrcp.f32 %v1360_v10 }
 0x3bf   : > { %v2963_v11 = vpop.eup %2962 }
 0x3c0   : > { %v1362_v12 = vmul.f32 %v2963_v11, %v2959_v3 }
 0x3c2   : > { %2775 = vmatmul.mubr.msk.f32.vlgmr.msra.gmra.mrb[6].mxu1 %vm1404_vm8, %v1362_v12 }
 0x3c3   : > { %v2965_v13 = vpop.eup %2964  ;;  %2778 = vmatpush3.msk.msra.mxu1 %vm1408_vm5, %v1519_v46  ;;  %2779 = vmatprep.mubr.msk.f32.mxu1 %vm2991_vm4, %v2989_v26 }
 0x3c4   : > { %v1364_v14 = vmul.f32 %v2965_v13, %v2961_v7  ;;  %2904 = vmatprep.subr.bf16.mxu1 %v2988_v25 }
 0x3c6   : > { %2780 = vmatmul.mubr.msk.f32.vlgmr.msra.gmra.mrb[8].mxu1 %vm1404_vm8, %v1364_v14 }
 0x3c7   : > { %2801 = vmatprep.mubr.msk.f32.mxu1 %vm2991_vm4, %v2989_v26 }
 0x495   : > { %v1477_v21 = vpop.f32.mrb[6].mxu1 }
 0x496   : > { %v2776_v22 = vpop.f32.mrb[7].mxu1 }
 0x497   : > { %v1985_v22 = vld [vmem:[%s495_s30 + $0x8] sm:$0xff] }
 0x499   : > { %v1591_v23 = vpop.f32.mrb[8].mxu1 }
 0x49a   : > { %v1601_v24 = vrot.slane %v1591_v23, 7  ;;  %v2781_v27 = vpop.f32.mrb[9].mxu1 }
 0x49b   : > { %v2133_v27 = vld [vmem:[%s3432_s10] sm:$0xff] }
 0x49c   : > { %v1602_v28 = vsel %vm989_vm1, %v1601_v24, %v1477_v21  ;;  %v1984_v21 = vld [vmem:[%s495_s30] sm:$0xff] }
 0x49d   : > { %2791 = vmatmul.mubr.msk.f32.vlgmr.msra.gmra.mrb[4].mxu0 %vm676_vm3, %v1602_v28  ;;  %v2134_v28 = vld [vmem:[%s3432_s10 + $0x8] sm:$0xff] }
 0x49e   : > { %2806 = vmatprep.mubr.msk.f32.mxu0 %vm2991_vm4, %v2989_v26  ;;  %2805 = vmatpush3.xpose.msk.msra.mxu0 %vm676_vm3, %v1803_v54 }
 0x49f   : > { %2814 = vmatprep.subr.mxu0 %v2989_v26 }
 0x570   : > { %v1671_v29 = vpop.f32.mrb[4].mxu0 }
 0x571   : > { %v1676_v30 = vrot.slane %v1671_v29, 1  ;;  %v2792_v31 = vpop.f32.mrb[5].mxu0  ;;  %v3264_v32 = vadd.f32 %v1671_v29, %v3094_v4  ;;  %v1700_v4 = vld [vmem:[%s3431_s9] sm:$0xff] }
 0x573   : > { %v3267_v33 = vadd.f32 %v1676_v30, %v3096_v5  ;;  %v1681_v36 = vmul.f32 %v3264_v32, %v3264_v32  ;;  %v1701_v5 = vld [vmem:[%s3431_s9 + $0x8] sm:$0xff]  ;;  %v2911_v30 = vpack.c.bf16 %v2134_v28, %v2133_v27 }
 0x574   : > { %v2905_v42 = vpack.c.bf16 %v1701_v5, %v1700_v4 }
 0x575   : > { %v1682_v35 = vmul.f32 %v3267_v33, %v3267_v33 }
 0x576   : > { %2906 = vmatpush3.bf16.msra.mxu1 %v2905_v42 }
 0x577   : > { %v1685_v37 = vrot.slane %v1682_v35, 7  ;;  %2907 = vmatprep.subr.bf16.mxu1 %v2988_v25 }
 0x579   : > { %v1686_v38 = vsel %vm989_vm1, %v1685_v37, %v1681_v36  ;;  %v2135_v37 = vld [vmem:[%s3432_s10 + $0x10] sm:$0xff] }
 0x57a   : > { %v1688_v39 = vsel %vm992_vm2, %v1686_v38, 0.0  ;;  %2909 = vmatpush3.bf16.msra.mxu1 %v2908_v44  ;;  %v2136_v38 = vld [vmem:[%s3432_s10 + $0x18] sm:$0xff] }
 0x57b   : > { %1689 = vadd.xlane.f32.xlu1 %v1688_v39  ;;  %2809 = vmatprep.subr.mxu1 %v2989_v26  ;;  %v2914_v39 = vpack.c.bf16 %v2136_v38, %v2135_v37  ;;  %v2429_v38 = vld [vmem:[%s3435_s13 + $0x18] sm:$0xff] }
 0x608   : > { %v1690_v45 = vpop.xlane.xlu1 %1689 }
 0x609   : > { %v1691_v46 = vmul.f32 0.03125, %v1690_v45 }
 0x60b   : > { %v1692_v47 = vadd.f32 1e-06, %v1691_v46 }
 0x60d   : > { %2966 = vrsqrt.f32 %v1692_v47 }
 0x617   : > { %v2967_v48 = vpop.eup %2966 }
 0x618   : > { %v1695_v49 = vrot.slane %v2967_v48, 1  ;;  %v1698_v51 = vmul.f32 %v2967_v48, %v3264_v32 }
 0x61a   : > { %v1699_v50 = vmul.f32 %v1695_v49, %v3267_v33 }
 0x61c   : > { %v1706_v52 = vrot.slane %v1699_v50, 7 }
 0x61e   : > { %v1707_v53 = vsel %vm989_vm1, %v1706_v52, %v1698_v51 }
 0x61f   : > { %2802 = vmatmul.mubr.msk.f32.vlgmr.msra.gmra.mrb[10].mxu1 %vm676_vm3, %v1707_v53 }
 0x620   : > { %2811 = vmatprep.mubr.msk.f32.mxu1 %vm2991_vm4, %v2989_v26  ;;  %2810 = vmatpush3.xpose.msk.msra.mxu1 %vm676_vm3, %v1804_v55  ;;  %v2238_v55 = vld [vmem:[%s3433_s11] sm:$0xff] }
 0x621   : > { %2819 = vmatprep.subr.mxu1 %v2989_v26 }
 0x6f2   : > { %v1776_v56 = vpop.f32.mrb[10].mxu1 }
 0x6f3   : > { %v1787_v57 = vrot.slane %v1776_v56, %v3131_v40  ;;  %v2803_v58 = vpop.f32.mrb[11].mxu1  ;;  %v2239_v56 = vld [vmem:[%s3433_s11 + $0x8] sm:$0xff] }
 0x6f5   : > { %v1788_v59 = vcombine.high %v1787_v57, %v1787_v57  ;;  %v1795_v60 = vrot.slane %v1787_v57, %v3131_v40  ;;  %v2241_v57 = vld [vmem:[%s3433_s11 + $0x18] sm:$0xff] }
 0x6f7   : > { %v1802_v61 = vrot.slane %v1788_v59, %v3131_v40  ;;  %2807 = vmatmul.mubr.msk.f32.vlgmr.msra.gmra.mrb[6].mxu0 %vm676_vm3, %v1795_v60  ;;  %v2319_v59 = vld [vmem:[%s3434_s12] sm:$0xff]  ;;  %v2320_v60 = vld [vmem:[%s3434_s12 + $0x8] sm:$0xff] }
 0x6f8   : > { %2816 = vmatprep.mubr.msk.f32.mxu0 %vm2991_vm4, %v2989_v26  ;;  %2815 = vmatpush3.msra.mxu0 %v1984_v21 }
 0x6f9   : > { %2812 = vmatmul.mubr.msk.f32.vlgmr.msra.gmra.mrb[12].mxu1 %vm676_vm3, %v1802_v61  ;;  %2910 = vmatprep.subr.bf16.mxu0 %v2988_v25  ;;  %v2321_v61 = vld [vmem:[%s3434_s12 + $0x10] sm:$0xff] }
 0x6fa   : > { %2821 = vmatprep.mubr.msk.f32.mxu1 %vm2991_vm4, %v2989_v26  ;;  %2820 = vmatpush3.msra.mxu1 %v1985_v22 }
 0x6fb   : > { %2916 = vmatprep.subr.bf16.mxu1 %v2988_v25 }
 0x7ca   : > { %v1876_v62 = vpop.f32.mrb[6].mxu0 }
 0x7cb   : > { %v1955_v34 = vmul.f32 0.17677669, %v1876_v62  ;;  %v2808_v0 = vpop.f32.mrb[7].mxu0  ;;  %v2923_v62 = vpack.c.bf16 %v2320_v60, %v2319_v59 }
 0x7cc   : > { %v1951_v1 = vpop.f32.mrb[12].mxu1  ;;  %v2323_v0 = vld [vmem:[%s3434_s12 + $0x20] sm:$0xff] }
 0x7cd   : > { %v1956_v3 = vmul.f32 0.17677669, %v1951_v1  ;;  %v2813_v6 = vpop.f32.mrb[13].mxu1  ;;  %v1959_v7 = vadd.f32 %v1957_v63, %v1955_v34  ;;  %v2322_v63 = vld [vmem:[%s3434_s12 + $0x18] sm:$0xff]  ;;  %v2324_v1 = vld [vmem:[%s3434_s12 + $0x28] sm:$0xff] }
 0x7ce   : > { %v2926_v34 = vpack.c.bf16 %v2322_v63, %v2321_v61 }
 0x7cf   : > { %v1962_v8 = vsel %vm1961_vm9, %v1959_v7, -inf  ;;  %v1960_v9 = vadd.f32 %v1958_v2, %v1956_v3  ;;  %v2929_v2 = vpack.c.bf16 %v2324_v1, %v2323_v0 }
 0x7d0   : > { %1963 = vmax.xlane.f32.xlu1 %v1962_v8 }
 0x7d1   : > { %v1965_v10 = vsel %vm1961_vm9, %v1960_v9, -inf }
 0x7d2   : > { %1966 = vmax.xlane.f32.xlu0 %v1965_v10 }
 0x85d   : > { %v1964_v11 = vpop.xlane.xlu1 %1963 }
 0x85e   : > { %v1968_v12 = vsub.f32 %v1959_v7, %v1964_v11 }
 0x85f   : > { %v1967_v13 = vpop.xlane.xlu0 %1966 }
 0x860   : > { %v1970_v14 = vmul.f32 1.442695, %v1968_v12  ;;  %v1969_v15 = vsub.f32 %v1960_v9, %v1967_v13 }
 0x862   : > { %2968 = vpow2.f32 %v1970_v14  ;;  %v1972_v16 = vmul.f32 1.442695, %v1969_v15  ;;  %v2325_v14 = vld [vmem:[%s3434_s12 + $0x30] sm:$0xff]  ;;  %v2326_v15 = vld [vmem:[%s3434_s12 + $0x38] sm:$0xff] }
 0x864   : > { %2970 = vpow2.f32 %v1972_v16  ;;  %v2932_v16 = vpack.c.bf16 %v2326_v15, %v2325_v14 }
 0x86c   : > { %v2969_v17 = vpop.eup %2968 }
 0x86d   : > { %v1974_v18 = vsel %vm1961_vm9, %v2969_v17, 0.0 }
 0x86e   : > { %v2971_v19 = vpop.eup %2970  ;;  %1975 = vadd.xlane.f32.xlu1 %v1974_v18 }
 0x86f   : > { %v1977_v20 = vsel %vm1961_vm9, %v2971_v19, 0.0 }
 0x870   : > { %1978 = vadd.xlane.f32.xlu0 %v1977_v20 }
 0x8fb   : > { %v1976_v23 = vpop.xlane.xlu1 %1975 }
 0x8fc   : > { %2972 = vrcp.f32 %v1976_v23 }
 0x8fd   : > { %v1979_v24 = vpop.xlane.xlu0 %1978 }
 0x8fe   : > { %2974 = vrcp.f32 %v1979_v24 }
 0x906   : > { %v2973_v29 = vpop.eup %2972 }
 0x907   : > { %v1981_v31 = vmul.f32 %v2973_v29, %v2969_v17 }
 0x908   : > { %v2975_v35 = vpop.eup %2974 }
 0x909   : > { %v1983_v36 = vmul.f32 %v2975_v35, %v2971_v19  ;;  %2817 = vmatmul.mubr.msk.f32.vlgmr.msra.gmra.mrb[8].mxu0 %vm1986_vm10, %v1981_v31  ;;  %v2426_v31 = vld [vmem:[%s3435_s13] sm:$0xff]  ;;  %v2427_v35 = vld [vmem:[%s3435_s13 + $0x8] sm:$0xff] }
 0x90a   : > { %2912 = vmatpush3.bf16.msra.mxu0 %v2911_v30  ;;  %2832 = vmatprep.mubr.msk.f32.mxu0 %vm2991_vm4, %v2989_v26  ;;  %v2935_v37 = vpack.c.bf16 %v2427_v35, %v2426_v31 }
 0x90b   : > { %2822 = vmatmul.mubr.msk.f32.vlgmr.msra.gmra.mrb[14].mxu1 %vm1986_vm10, %v1983_v36  ;;  %2913 = vmatprep.subr.bf16.mxu0 %v2988_v25  ;;  %v2428_v36 = vld [vmem:[%s3435_s13 + $0x10] sm:$0xff] }
 0x90c   : > { %2843 = vmatprep.mubr.msk.f32.mxu1 %vm2991_vm4, %v2989_v26 }
 0x90e   : > { %2915 = vmatpush3.bf16.msra.mxu0 %v2914_v39  ;;  %v2938_v39 = vpack.c.bf16 %v2429_v38, %v2428_v36 }
 0x90f   : > { %2922 = vmatprep.subr.bf16.mxu0 %v2988_v25 }
 0x9dc   : > { %v2056_v4 = vpop.f32.mrb[8].mxu0 }
 0x9dd   : > { %v2818_v5 = vpop.f32.mrb[9].mxu0 }
 0x9de   : > { %v2129_v41 = vpop.f32.mrb[14].mxu1 }
 0x9df   : > { %v2139_v42 = vrot.slane %v2129_v41, 7  ;;  %v2823_v43 = vpop.f32.mrb[15].mxu1 }
 0x9e1   : > { %v2140_v44 = vsel %vm989_vm1, %v2139_v42, %v2056_v4 }
 0x9e2   : > { %2833 = vmatmul.mubr.msk.f32.vlgmr.msra.gmra.mrb[10].mxu0 %vm676_vm3, %v2140_v44 }
 0x9e3   : > { %2862 = vmatprep.mubr.msk.f32.mxu0 %vm2991_vm4, %v2989_v26  ;;  %2924 = vmatpush3.bf16.msra.mxu0 %v2923_v62 }
 0x9e4   : > { %2925 = vmatprep.subr.bf16.mxu0 %v2988_v25 }
 0x9e7   : > { %2927 = vmatpush3.bf16.msra.mxu0 %v2926_v34 }
 0x9e8   : > { %2928 = vmatprep.subr.bf16.mxu0 %v2988_v25 }
 0x9eb   : > { %2930 = vmatpush3.bf16.msra.mxu0 %v2929_v2 }
 0x9ec   : > { %2931 = vmatprep.subr.bf16.mxu0 %v2988_v25 }
 0x9ef   : > { %2933 = vmatpush3.bf16.msra.mxu0 %v2932_v16 }
 0xab5   : > { %v2209_v45 = vpop.f32.mrb[10].mxu0 }
 0xab6   : > { %v2214_v46 = vrot.slane %v2209_v45, 1  ;;  %v2834_v47 = vpop.f32.mrb[11].mxu0  ;;  %v2217_v48 = vadd.f32 %v2209_v45, %v3264_v32  ;;  %v2240_v32 = vld [vmem:[%s3433_s11 + $0x10] sm:$0xff] }
 0xab7   : > { %v2920_v58 = vpack.c.bf16 %v2241_v57, %v2240_v32 }
 0xab8   : > { %v2218_v49 = vadd.f32 %v2214_v46, %v3267_v33  ;;  %v2219_v51 = vmul.f32 %v2217_v48, %v2217_v48  ;;  %v2917_v33 = vpack.c.bf16 %v2239_v56, %v2238_v55 }
 0xaba   : > { %v2220_v50 = vmul.f32 %v2218_v49, %v2218_v49  ;;  %2918 = vmatpush3.bf16.msra.mxu1 %v2917_v33 }
 0xabb   : > { %2919 = vmatprep.subr.bf16.mxu1 %v2988_v25 }
 0xabc   : > { %v2223_v52 = vrot.slane %v2220_v50, 7 }
 0xabe   : > { %v2224_v53 = vsel %vm989_vm1, %v2223_v52, %v2219_v51  ;;  %2921 = vmatpush3.bf16.msra.mxu1 %v2920_v58 }
 0xabf   : > { %v2226_v54 = vsel %vm992_vm2, %v2224_v53, 0.0  ;;  %2934 = vmatprep.subr.bf16.mxu1 %v2988_v25 }
 0xac0   : > { %2227 = vadd.xlane.f32.xlu0 %v2226_v54 }
 0xb4d   : > { %v2228_v3 = vpop.xlane.xlu0 %2227 }
 0xb4e   : > { %v2229_v6 = vmul.f32 0.03125, %v2228_v3 }
 0xb50   : > { %v2230_v7 = vadd.f32 1e-06, %v2229_v6 }
 0xb52   : > { %2976 = vrsqrt.f32 %v2230_v7 }
 0xb5c   : > { %v2977_v8 = vpop.eup %2976 }
 0xb5d   : > { %v2233_v9 = vrot.slane %v2977_v8, 1  ;;  %v2236_v11 = vmul.f32 %v2977_v8, %v2217_v48 }
 0xb5f   : > { %v2237_v10 = vmul.f32 %v2233_v9, %v2218_v49 }
 0xb61   : > { %v2244_v12 = vrot.slane %v2237_v10, 7 }
 0xb63   : > { %v2245_v13 = vsel %vm989_vm1, %v2244_v12, %v2236_v11 }
 0xb64   : > { %2844 = vmatmul.mubr.msk.f32.vlgmr.msra.gmra.mrb[16].mxu1 %vm676_vm3, %v2245_v13 }
 0xb65   : > { %2873 = vmatprep.mubr.msk.f32.mxu1 %vm2991_vm4, %v2989_v26  ;;  %2936 = vmatpush3.bf16.msra.mxu1 %v2935_v37 }
 0xb66   : > { %2937 = vmatprep.subr.bf16.mxu1 %v2988_v25 }
 0xb69   : > { %2939 = vmatpush3.bf16.msra.mxu1 %v2938_v39 }
 0xc37   : > { %v2314_v17 = vpop.f32.mrb[16].mxu1 }
 0xc38   : > { %v2318_v18 = vmax.f32 %v2314_v17, 0.0  ;;  %v2845_v19 = vpop.f32.mrb[17].mxu1 }
 0xc3a   : > { %2863 = vmatmul.mubr.msk.f32.vlgmr.msra.gmra.mrb[12].mxu0 %vm2327_vm11, %v2318_v18 }
 0xd0d   : > { %v2397_v20 = vpop.f32.mrb[12].mxu0 }
 0xd0e   : > { %v2402_v21 = vrot.slane %v2397_v20, 1  ;;  %v2864_v22 = vpop.f32.mrb[13].mxu0  ;;  %v2405_v23 = vadd.f32 %v2397_v20, %v2217_v48 }
 0xd10   : > { %v2406_v26 = vadd.f32 %v2402_v21, %v2218_v49  ;;  %v2407_v27 = vmul.f32 %v2405_v23, %v2405_v23 }
 0xd12   : > { %v2408_v24 = vmul.f32 %v2406_v26, %v2406_v26 }
 0xd14   : > { %v2411_v28 = vrot.slane %v2408_v24, 7 }
 0xd16   : > { %v2412_v29 = vsel %vm989_vm1, %v2411_v28, %v2407_v27 }
 0xd17   : > { %v2414_v30 = vsel %vm992_vm2, %v2412_v29, 0.0 }
 0xd18   : > { %2415 = vadd.xlane.f32.xlu1 %v2414_v30 }
 0xda5   : > { %v2416_v4 = vpop.xlane.xlu1 %2415 }
 0xda6   : > { %v2417_v5 = vmul.f32 0.03125, %v2416_v4 }
 0xda8   : > { %v2418_v41 = vadd.f32 1e-06, %v2417_v5 }
 0xdaa   : > { %2978 = vrsqrt.f32 %v2418_v41 }
 0xdb4   : > { %v2979_v42 = vpop.eup %2978 }
 0xdb5   : > { %v2421_v43 = vrot.slane %v2979_v42, 1  ;;  %v2424_v45 = vmul.f32 %v2979_v42, %v2405_v23 }
 0xdb7   : > { %v2425_v44 = vmul.f32 %v2421_v43, %v2406_v26 }
 0xdb9   : > { %v2432_v46 = vrot.slane %v2425_v44, 7 }
 0xdbb   : > { %v2433_v47 = vsel %vm989_vm1, %v2432_v46, %v2424_v45 }
 0xdbc   : > { %2874 = vmatmul.mubr.msk.f32.vlgmr.msra.gmra.mrb[18].mxu1 %vm676_vm3, %v2433_v47 }
 0xe8f   : > { %v2502_v48 = vpop.f32.mrb[18].mxu1 }
 0xe90   : > { %v2513_v25 = vrot.slane %v2502_v48, %v3131_v40  ;;  %v2875_v49 = vpop.f32.mrb[19].mxu1 }
 0xe92   : > { %v2514_v50 = vcombine.high %v2513_v25, %v2513_v25  ;;  %2658 = vst.sshfl [vmem:[%s505_s28] sm:$0x1 pattern:$0x73625140] %v2513_v25 }
 0xe94   : > { %2659 = vst.sshfl [vmem:[%s505_s28 + $0x1] sm:$0x1 pattern:$0x73625140] %v2514_v50 }
 0xe95 PF: > { %s25_s15 = sadd.s32 1, %s2986_s15  }
 0xe96   : > { %p22_p4 = scmp.ge.s32.totalorder %s25_s15, 4  }
 0xe98   :  { %24 = sbr.rel (!%p22_p4) target bundleno = 2 (0x2), region = 112 }

</bundles_post_ra>
